<compile_context>
chip_gen: v5e
topology: v5e:2x2
jax: 0.10.0
libtpu: 0.0.40
codegen_flags: <defaults>
</compile_context>

<pallas_src>
import functools

import jax
import jax.numpy as jnp
import numpy as np
from jax.experimental import pallas as pl
from jax.experimental.pallas import tpu as pltpu

LN_EPS = 1e-5
NEG_INF = -1e9
BF16 = jnp.bfloat16


def _layer_norm(x, gamma, beta):
    # Fused single-pass statistics: var = E[x^2] - E[x]^2 (one reduction pass
    # less per LN; 3 LNs per layer).  Shared by kernel and reference.
    m = jnp.mean(x, axis=-1, keepdims=True)
    ms = jnp.mean(x * x, axis=-1, keepdims=True)
    var = ms - m * m
    return (x - m) * jax.lax.rsqrt(var + LN_EPS) * gamma + beta


# ---------------------------------------------------------------------------
# Fused decoder-layer kernel (one batch element per grid step)
# ---------------------------------------------------------------------------
def _decoder_layer_kernel(
        dec_ref, enc_ref, smask_ref, cmask_ref,
        sa_wq_ref, sa_wk_ref, sa_wv_ref, sa_wo_ref, sa_g_ref, sa_b_ref,
        ca_wq_ref, ca_wk_ref, ca_wv_ref, ca_wo_ref, ca_g_ref, ca_b_ref,
        ff_w1_ref, ff_w2_ref, ff_g_ref, ff_b_ref,
        out_ref, sattn_ref, cattn_ref,
        *, n_heads, d_k, d_v):
    x = dec_ref[0]      # (Tq, D) f32
    enc = enc_ref[0]    # (Tk, D) f32
    scale = jnp.float32(1.0 / np.sqrt(d_k))

    def attention(xq, xkv, mask, wq_ref, wk_ref, wv_ref, wo_ref,
                  g_ref, b_ref, attn_ref):
        # Full-width Q/K/V projections: bf16 operands, f32 MXU accumulation.
        xq_bf = xq.astype(BF16)
        xkv_bf = xkv.astype(BF16)
        q = jnp.dot(xq_bf, wq_ref[...],
                    preferred_element_type=jnp.float32) * scale   # f32
        k = jnp.dot(xkv_bf, wk_ref[...], preferred_element_type=jnp.float32)
        v = jnp.dot(xkv_bf, wv_ref[...], preferred_element_type=jnp.float32)
        q_bf = q.astype(BF16)
        k_bf = k.astype(BF16)
        v_bf = v.astype(BF16)

        # Additive mask bias computed once in f32 (added to the f32 scores,
        # never to bf16 operands).
        bias = jnp.where(mask != 0, jnp.float32(NEG_INF), jnp.float32(0.0))

        # Static per-head unroll (small n_heads here).  Per head: one 2-D
        # dot_general contracting d_k (no explicit transpose), exact f32
        # softmax, context kept in vregs.
        p_heads = []
        ctx_heads = []
        for h in range(n_heads):
            q_h = q_bf[:, h * d_k:(h + 1) * d_k]          # (Tq, dk) bf16
            k_h = k_bf[:, h * d_k:(h + 1) * d_k]          # (Tk, dk) bf16
            v_h = v_bf[:, h * d_v:(h + 1) * d_v]          # (Tk, dv) bf16
            s_h = jax.lax.dot_general(
                q_h, k_h, (((1,), (1,)), ((), ())),
                preferred_element_type=jnp.float32) + bias    # (Tq, Tk) f32
            m_h = jnp.max(s_h, axis=-1, keepdims=True)
            e_h = jnp.exp(s_h - m_h)
            l_h = jnp.sum(e_h, axis=-1, keepdims=True)
            p_h = e_h / l_h                                   # exact softmax
            p_heads.append(p_h)
            ctx_heads.append(jnp.dot(p_h.astype(BF16), v_h,
                                     preferred_element_type=jnp.float32))

        # Single lane-dense store of the whole (Tq, H*Tk) probability slab
        # (no per-head masked partial stores).
        attn_ref[0] = jnp.concatenate(p_heads, axis=-1).astype(attn_ref.dtype)

        # Heads assembled in registers; ONE output-projection matmul with the
        # full H*d_v contraction width (no VMEM scratch round-trip).
        ctx = jnp.concatenate(ctx_heads, axis=-1)             # (Tq, H*dv) f32
        proj = jnp.dot(ctx.astype(BF16), wo_ref[...],
                       preferred_element_type=jnp.float32)
        return _layer_norm(proj + xq, g_ref[...], b_ref[...])

    # Decoder self-attention.
    out1 = attention(x, x, smask_ref[0],
                     sa_wq_ref, sa_wk_ref, sa_wv_ref, sa_wo_ref,
                     sa_g_ref, sa_b_ref, sattn_ref)
    # Decoder-encoder cross-attention.
    out2 = attention(out1, enc, cmask_ref[0],
                     ca_wq_ref, ca_wk_ref, ca_wv_ref, ca_wo_ref,
                     ca_g_ref, ca_b_ref, cattn_ref)
    # Position-wise FFN (bias-free Linears) + residual + LayerNorm.
    hdn = jnp.maximum(
        jnp.dot(out2.astype(BF16), ff_w1_ref[...],
                preferred_element_type=jnp.float32), 0.0)
    y = jnp.dot(hdn.astype(BF16), ff_w2_ref[...],
                preferred_element_type=jnp.float32)
    out = _layer_norm(y + out2, ff_g_ref[...], ff_b_ref[...])
    out_ref[0] = out.astype(out_ref.dtype)


def decoder_layer(dec_inputs, enc_outputs, self_mask, cross_mask, p,
                  *, n_heads, d_k, d_v):
    B, Tq, D = dec_inputs.shape
    Tk = enc_outputs.shape[1]
    d_ff = p["ff_w1"].shape[1]
    h_dk = n_heads * d_k
    h_dv = n_heads * d_v

    kern = functools.partial(_decoder_layer_kernel,
                             n_heads=n_heads, d_k=d_k, d_v=d_v)

    # Weights fed to the kernel in bf16: halves weight VMEM + weight DMA and
    # lets the MXU run single-pass bf16 x bf16 -> f32.
    def wcast(name):
        return p[name].astype(BF16)

    def full(shape):
        # Weight / LN parameter blocks: same whole-array block every grid step.
        # TODO(synk): at production sizes add pipeline_mode=pl.Buffered(1)
        # here (constant block index => second pipeline buffer is wasted
        # VMEM) and tile d_ff on an extra "arbitrary" grid axis for v7x fit.
        return pl.BlockSpec(shape, lambda b: (0, 0))

    out, sattn_flat, cattn_flat = pl.pallas_call(
        kern,
        out_shape=(
            jax.ShapeDtypeStruct((B, Tq, D), jnp.float32),
            jax.ShapeDtypeStruct((B, Tq, n_heads * Tq), jnp.float32),
            jax.ShapeDtypeStruct((B, Tq, n_heads * Tk), jnp.float32),
        ),
        grid_spec=pltpu.PrefetchScalarGridSpec(
            num_scalar_prefetch=0,
            grid=(B,),
            in_specs=[
                pl.BlockSpec((1, Tq, D), lambda b: (b, 0, 0)),
                pl.BlockSpec((1, Tk, D), lambda b: (b, 0, 0)),
                pl.BlockSpec((1, Tq, Tq), lambda b: (b, 0, 0)),
                pl.BlockSpec((1, Tq, Tk), lambda b: (b, 0, 0)),
                full((D, h_dk)), full((D, h_dk)), full((D, h_dv)),
                full((h_dv, D)), full((1, D)), full((1, D)),
                full((D, h_dk)), full((D, h_dk)), full((D, h_dv)),
                full((h_dv, D)), full((1, D)), full((1, D)),
                full((D, d_ff)), full((d_ff, D)),
                full((1, D)), full((1, D)),
            ],
            out_specs=[
                pl.BlockSpec((1, Tq, D), lambda b: (b, 0, 0)),
                pl.BlockSpec((1, Tq, n_heads * Tq), lambda b: (b, 0, 0)),
                pl.BlockSpec((1, Tq, n_heads * Tk), lambda b: (b, 0, 0)),
            ],
        ),
        compiler_params=pltpu.CompilerParams(
            dimension_semantics=("parallel",),
            # Above the 16/32 MiB default scoped limits, below every chip's
            # physical VMEM (64 MiB on v7x).
            vmem_limit_bytes=48 * 1024 * 1024),
    )(dec_inputs, enc_outputs, self_mask, cross_mask,
      wcast("sa_wq"), wcast("sa_wk"), wcast("sa_wv"), wcast("sa_wo"),
      p["sa_gamma"], p["sa_beta"],
      wcast("ca_wq"), wcast("ca_wk"), wcast("ca_wv"), wcast("ca_wo"),
      p["ca_gamma"], p["ca_beta"],
      wcast("ff_w1"), wcast("ff_w2"), p["ff_gamma"], p["ff_beta"])

    # Unpack lane-dense attention slabs back to torch layout (B, H, Tq, Tk).
    self_attn = sattn_flat.reshape(B, Tq, n_heads, Tq).transpose(0, 2, 1, 3)
    cross_attn = cattn_flat.reshape(B, Tq, n_heads, Tk).transpose(0, 2, 1, 3)
    return out, self_attn, cross_attn


# ---------------------------------------------------------------------------
# Pure-JAX reference (mirrors the PyTorch semantics; same bf16-operand /
# f32-accumulate matmul precision as the kernel so the check is tight)
# ---------------------------------------------------------------------------
def _mha_ref(xq, xkv, mask, wq, wk, wv, wo, gamma, beta, n_heads, d_k, d_v):
    B, Tq, D = xq.shape
    Tk = xkv.shape[1]
    f32 = jnp.float32
    scale = jnp.float32(1.0 / np.sqrt(d_k))
    q = jnp.einsum("btd,dh->bth", xq.astype(BF16), wq.astype(BF16),
                   preferred_element_type=f32) * scale
    k = jnp.einsum("btd,dh->bth", xkv.astype(BF16), wk.astype(BF16),
                   preferred_element_type=f32)
    v = jnp.einsum("btd,dh->bth", xkv.astype(BF16), wv.astype(BF16),
                   preferred_element_type=f32)
    qh = q.reshape(B, Tq, n_heads, d_k).transpose(0, 2, 1, 3)
    kh = k.reshape(B, Tk, n_heads, d_k).transpose(0, 2, 1, 3)
    vh = v.reshape(B, Tk, n_heads, d_v).transpose(0, 2, 1, 3)
    scores = jnp.einsum("bhqd,bhkd->bhqk", qh.astype(BF16), kh.astype(BF16),
                        preferred_element_type=f32)
    scores = jnp.where(mask[:, None, :, :] != 0, NEG_INF, scores)
    attn = jax.nn.softmax(scores, axis=-1)
    ctx = jnp.einsum("bhqk,bhkd->bhqd", attn.astype(BF16), vh.astype(BF16),
                     preferred_element_type=f32)
    ctx = ctx.transpose(0, 2, 1, 3).reshape(B, Tq, n_heads * d_v)
    out = jnp.einsum("bth,hd->btd", ctx.astype(BF16), wo.astype(BF16),
                     preferred_element_type=f32) + xq
    return _layer_norm(out, gamma, beta), attn


def _ffn_ref(x, w1, w2, gamma, beta):
    f32 = jnp.float32
    h = jnp.maximum(jnp.einsum("btd,df->btf", x.astype(BF16), w1.astype(BF16),
                               preferred_element_type=f32), 0.0)
    y = jnp.einsum("btf,fd->btd", h.astype(BF16), w2.astype(BF16),
                   preferred_element_type=f32) + x
    return _layer_norm(y, gamma, beta)


def decoder_layer_ref(dec_inputs, enc_outputs, self_mask, cross_mask, p,
                      *, n_heads, d_k, d_v):
    out, sa = _mha_ref(dec_inputs, dec_inputs, self_mask,
                       p["sa_wq"], p["sa_wk"], p["sa_wv"], p["sa_wo"],
                       p["sa_gamma"], p["sa_beta"], n_heads, d_k, d_v)
    out, ca = _mha_ref(out, enc_outputs, cross_mask,
                       p["ca_wq"], p["ca_wk"], p["ca_wv"], p["ca_wo"],
                       p["ca_gamma"], p["ca_beta"], n_heads, d_k, d_v)
    out = _ffn_ref(out, p["ff_w1"], p["ff_w2"], p["ff_gamma"], p["ff_beta"])
    return out, sa, ca


def init_params(key, d_model, d_k, d_v, n_heads, d_ff):
    ks = jax.random.split(key, 10)

    def w(k, shape):
        return (jax.random.normal(k, shape, jnp.float32)
                / np.sqrt(shape[0])).astype(jnp.float32)

    ones = jnp.ones((1, d_model), jnp.float32)
    zeros = jnp.zeros((1, d_model), jnp.float32)
    return {
        "sa_wq": w(ks[0], (d_model, n_heads * d_k)),
        "sa_wk": w(ks[1], (d_model, n_heads * d_k)),
        "sa_wv": w(ks[2], (d_model, n_heads * d_v)),
        "sa_wo": w(ks[3], (n_heads * d_v, d_model)),
        "sa_gamma": ones, "sa_beta": zeros,
        "ca_wq": w(ks[4], (d_model, n_heads * d_k)),
        "ca_wk": w(ks[5], (d_model, n_heads * d_k)),
        "ca_wv": w(ks[6], (d_model, n_heads * d_v)),
        "ca_wo": w(ks[7], (n_heads * d_v, d_model)),
        "ca_gamma": ones, "ca_beta": zeros,
        "ff_w1": w(ks[8], (d_model, d_ff)),
        "ff_w2": w(ks[9], (d_ff, d_model)),
        "ff_gamma": ones, "ff_beta": zeros,
    }


if __name__ == "__main__":
    B, T_TGT, T_SRC = 2, 8, 8
    D_MODEL, D_K, D_V, N_HEADS, D_FF = 32, 8, 8, 4, 64

    key = jax.random.PRNGKey(0)
    k_in, k_enc, k_par = jax.random.split(key, 3)

    dec_inputs = jax.random.normal(k_in, (B, T_TGT, D_MODEL), jnp.float32)
    enc_outputs = jax.random.normal(k_enc, (B, T_SRC, D_MODEL), jnp.float32)

    # Causal (subsequent-position) mask for decoder self-attention.
    causal = jnp.triu(jnp.ones((T_TGT, T_TGT), jnp.int32), k=1)
    dec_self_mask = jnp.tile(causal[None], (B, 1, 1))
    # Padding-style mask for cross-attention (mask last 2 src positions of
    # the second batch element).
    dec_enc_mask = jnp.zeros((B, T_TGT, T_SRC), jnp.int32).at[1, :, -2:].set(1)

    params = init_params(k_par, D_MODEL, D_K, D_V, N_HEADS, D_FF)

    out, self_attn, cross_attn = decoder_layer(
        dec_inputs, enc_outputs, dec_self_mask, dec_enc_mask, params,
        n_heads=N_HEADS, d_k=D_K, d_v=D_V)
    jax.block_until_ready((out, self_attn, cross_attn))

    ref_out, ref_sa, ref_ca = decoder_layer_ref(
        dec_inputs, enc_outputs, dec_self_mask, dec_enc_mask, params,
        n_heads=N_HEADS, d_k=D_K, d_v=D_V)

    assert np.allclose(np.asarray(out), np.asarray(ref_out),
                       atol=3e-3, rtol=3e-3)
    assert np.allclose(np.asarray(self_attn), np.asarray(ref_sa),
                       atol=3e-3, rtol=3e-3)
    assert np.allclose(np.asarray(cross_attn), np.asarray(ref_ca),
                       atol=3e-3, rtol=3e-3)

    print("KERNEL_OK")
</pallas_src>

<mosaic_0001>
module attributes {stable_mosaic.version = 11 : i64} {
  func.func @_decoder_layer_kernel(%arg0: i32, %arg1: memref<1x8x32xf32, #tpu.memory_space<vmem>>, %arg2: memref<1x8x32xf32, #tpu.memory_space<vmem>>, %arg3: memref<1x8x8xi32, #tpu.memory_space<vmem>>, %arg4: memref<1x8x8xi32, #tpu.memory_space<vmem>>, %arg5: memref<32x32xbf16, #tpu.memory_space<vmem>>, %arg6: memref<32x32xbf16, #tpu.memory_space<vmem>>, %arg7: memref<32x32xbf16, #tpu.memory_space<vmem>>, %arg8: memref<32x32xbf16, #tpu.memory_space<vmem>>, %arg9: memref<1x32xf32, #tpu.memory_space<vmem>>, %arg10: memref<1x32xf32, #tpu.memory_space<vmem>>, %arg11: memref<32x32xbf16, #tpu.memory_space<vmem>>, %arg12: memref<32x32xbf16, #tpu.memory_space<vmem>>, %arg13: memref<32x32xbf16, #tpu.memory_space<vmem>>, %arg14: memref<32x32xbf16, #tpu.memory_space<vmem>>, %arg15: memref<1x32xf32, #tpu.memory_space<vmem>>, %arg16: memref<1x32xf32, #tpu.memory_space<vmem>>, %arg17: memref<32x64xbf16, #tpu.memory_space<vmem>>, %arg18: memref<64x32xbf16, #tpu.memory_space<vmem>>, %arg19: memref<1x32xf32, #tpu.memory_space<vmem>>, %arg20: memref<1x32xf32, #tpu.memory_space<vmem>>, %arg21: memref<1x8x32xf32, #tpu.memory_space<vmem>>, %arg22: memref<1x8x32xf32, #tpu.memory_space<vmem>>, %arg23: memref<1x8x32xf32, #tpu.memory_space<vmem>>) attributes {dimension_semantics = [#tpu.dimension_semantics<parallel>], iteration_bounds = array<i64: 2>, scalar_prefetch = 0 : i64, scratch_operands = 0 : i64, tpu.core_type = #tpu.core_type<tc>, window_params = [{transform_indices = @transform_0, window_bounds = array<i64: 1, 8, 32>}, {transform_indices = @transform_1, window_bounds = array<i64: 1, 8, 32>}, {transform_indices = @transform_2, window_bounds = array<i64: 1, 8, 8>}, {transform_indices = @transform_3, window_bounds = array<i64: 1, 8, 8>}, {pipeline_mode = #tpu.pipeline_mode<synchronous>, transform_indices = @transform_4, window_bounds = array<i64: 32, 32>}, {pipeline_mode = #tpu.pipeline_mode<synchronous>, transform_indices = @transform_5, window_bounds = array<i64: 32, 32>}, {pipeline_mode = #tpu.pipeline_mode<synchronous>, transform_indices = @transform_6, window_bounds = array<i64: 32, 32>}, {pipeline_mode = #tpu.pipeline_mode<synchronous>, transform_indices = @transform_7, window_bounds = array<i64: 32, 32>}, {pipeline_mode = #tpu.pipeline_mode<synchronous>, transform_indices = @transform_8, window_bounds = array<i64: 1, 32>}, {pipeline_mode = #tpu.pipeline_mode<synchronous>, transform_indices = @transform_9, window_bounds = array<i64: 1, 32>}, {pipeline_mode = #tpu.pipeline_mode<synchronous>, transform_indices = @transform_10, window_bounds = array<i64: 32, 32>}, {pipeline_mode = #tpu.pipeline_mode<synchronous>, transform_indices = @transform_11, window_bounds = array<i64: 32, 32>}, {pipeline_mode = #tpu.pipeline_mode<synchronous>, transform_indices = @transform_12, window_bounds = array<i64: 32, 32>}, {pipeline_mode = #tpu.pipeline_mode<synchronous>, transform_indices = @transform_13, window_bounds = array<i64: 32, 32>}, {pipeline_mode = #tpu.pipeline_mode<synchronous>, transform_indices = @transform_14, window_bounds = array<i64: 1, 32>}, {pipeline_mode = #tpu.pipeline_mode<synchronous>, transform_indices = @transform_15, window_bounds = array<i64: 1, 32>}, {pipeline_mode = #tpu.pipeline_mode<synchronous>, transform_indices = @transform_16, window_bounds = array<i64: 32, 64>}, {pipeline_mode = #tpu.pipeline_mode<synchronous>, transform_indices = @transform_17, window_bounds = array<i64: 64, 32>}, {pipeline_mode = #tpu.pipeline_mode<synchronous>, transform_indices = @transform_18, window_bounds = array<i64: 1, 32>}, {pipeline_mode = #tpu.pipeline_mode<synchronous>, transform_indices = @transform_19, window_bounds = array<i64: 1, 32>}, {transform_indices = @transform_20, window_bounds = array<i64: 1, 8, 32>}, {transform_indices = @transform_21, window_bounds = array<i64: 1, 8, 32>}, {transform_indices = @transform_22, window_bounds = array<i64: 1, 8, 32>}]} {
    %c0 = arith.constant 0 : index
    %c0_0 = arith.constant 0 : index
    %c0_1 = arith.constant 0 : index
    %0 = vector.load %arg1[%c0, %c0_0, %c0_1] : memref<1x8x32xf32, #tpu.memory_space<vmem>>, vector<1x8x32xf32>
    %1 = vector.shape_cast %0 : vector<1x8x32xf32> to vector<8x32xf32>
    %c0_2 = arith.constant 0 : index
    %c0_3 = arith.constant 0 : index
    %c0_4 = arith.constant 0 : index
    %2 = vector.load %arg2[%c0_2, %c0_3, %c0_4] : memref<1x8x32xf32, #tpu.memory_space<vmem>>, vector<1x8x32xf32>
    %3 = vector.shape_cast %2 : vector<1x8x32xf32> to vector<8x32xf32>
    %c0_5 = arith.constant 0 : index
    %c0_6 = arith.constant 0 : index
    %c0_7 = arith.constant 0 : index
    %4 = vector.load %arg3[%c0_5, %c0_6, %c0_7] : memref<1x8x8xi32, #tpu.memory_space<vmem>>, vector<1x8x8xi32>
    %5 = vector.shape_cast %4 : vector<1x8x8xi32> to vector<8x8xi32>
    %6 = arith.truncf %1 : vector<8x32xf32> to vector<8x32xbf16>
    %7 = arith.truncf %1 : vector<8x32xf32> to vector<8x32xbf16>
    %c0_8 = arith.constant 0 : index
    %c0_9 = arith.constant 0 : index
    %8 = vector.load %arg5[%c0_8, %c0_9] : memref<32x32xbf16, #tpu.memory_space<vmem>>, vector<32x32xbf16>
    %cst = arith.constant dense<0.000000e+00> : vector<8x32xf32>
    %9 = tpu.matmul %6, %8, %cst {dimension_numbers = #tpu.dot_dimension_numbers<[1], [0], [0], [1], [0, 0, 1, 1], [], []>} : vector<8x32xbf16>, vector<32x32xbf16>, vector<8x32xf32> -> vector<8x32xf32>
    %cst_10 = arith.constant 0.353553385 : f32
    %10 = vector.broadcast %cst_10 : f32 to vector<8x32xf32>
    %11 = arith.mulf %9, %10 : vector<8x32xf32>
    %c0_11 = arith.constant 0 : index
    %c0_12 = arith.constant 0 : index
    %12 = vector.load %arg6[%c0_11, %c0_12] : memref<32x32xbf16, #tpu.memory_space<vmem>>, vector<32x32xbf16>
    %cst_13 = arith.constant dense<0.000000e+00> : vector<8x32xf32>
    %13 = tpu.matmul %7, %12, %cst_13 {dimension_numbers = #tpu.dot_dimension_numbers<[1], [0], [0], [1], [0, 0, 1, 1], [], []>} : vector<8x32xbf16>, vector<32x32xbf16>, vector<8x32xf32> -> vector<8x32xf32>
    %c0_14 = arith.constant 0 : index
    %c0_15 = arith.constant 0 : index
    %14 = vector.load %arg7[%c0_14, %c0_15] : memref<32x32xbf16, #tpu.memory_space<vmem>>, vector<32x32xbf16>
    %cst_16 = arith.constant dense<0.000000e+00> : vector<8x32xf32>
    %15 = tpu.matmul %7, %14, %cst_16 {dimension_numbers = #tpu.dot_dimension_numbers<[1], [0], [0], [1], [0, 0, 1, 1], [], []>} : vector<8x32xbf16>, vector<32x32xbf16>, vector<8x32xf32> -> vector<8x32xf32>
    %16 = arith.truncf %11 : vector<8x32xf32> to vector<8x32xbf16>
    %17 = arith.truncf %13 : vector<8x32xf32> to vector<8x32xbf16>
    %18 = arith.truncf %15 : vector<8x32xf32> to vector<8x32xbf16>
    %c0_i32 = arith.constant 0 : i32
    %19 = vector.broadcast %c0_i32 : i32 to vector<8x8xi32>
    %20 = arith.cmpi ne, %5, %19 : vector<8x8xi32>
    %cst_17 = arith.constant -1.000000e+09 : f32
    %cst_18 = arith.constant 0.000000e+00 : f32
    %21 = vector.broadcast %cst_17 : f32 to vector<8x8xf32>
    %22 = vector.broadcast %cst_18 : f32 to vector<8x8xf32>
    %23 = arith.select %20, %21, %22 : vector<8x8xi1>, vector<8x8xf32>
    %24 = vector.extract_strided_slice %16 {offsets = [0, 0], sizes = [8, 8], strides = [1, 1]} : vector<8x32xbf16> to vector<8x8xbf16>
    %25 = vector.extract_strided_slice %17 {offsets = [0, 0], sizes = [8, 8], strides = [1, 1]} : vector<8x32xbf16> to vector<8x8xbf16>
    %26 = vector.extract_strided_slice %18 {offsets = [0, 0], sizes = [8, 8], strides = [1, 1]} : vector<8x32xbf16> to vector<8x8xbf16>
    %cst_19 = arith.constant dense<0.000000e+00> : vector<8x8xf32>
    %27 = tpu.matmul %24, %25, %cst_19 {dimension_numbers = #tpu.dot_dimension_numbers<[1], [1], [0], [0], [0, 0, 1, 0], [], []>} : vector<8x8xbf16>, vector<8x8xbf16>, vector<8x8xf32> -> vector<8x8xf32>
    %28 = arith.addf %27, %23 : vector<8x8xf32>
    %cst_20 = arith.constant dense<0xFF800000> : vector<8xf32>
    %29 = vector.multi_reduction <maximumf>, %28, %cst_20 [1] : vector<8x8xf32> to vector<8xf32>
    %30 = vector.shape_cast %29 : vector<8xf32> to vector<8x1xf32>
    %31 = vector.broadcast %30 : vector<8x1xf32> to vector<8x8xf32>
    %32 = arith.subf %28, %31 : vector<8x8xf32>
    %33 = math.exp %32 : vector<8x8xf32>
    %cst_21 = arith.constant dense<0.000000e+00> : vector<8xf32>
    %34 = vector.multi_reduction <add>, %33, %cst_21 [1] : vector<8x8xf32> to vector<8xf32>
    %35 = vector.shape_cast %34 : vector<8xf32> to vector<8x1xf32>
    %36 = vector.broadcast %35 : vector<8x1xf32> to vector<8x8xf32>
    %37 = arith.divf %33, %36 : vector<8x8xf32>
    %38 = arith.truncf %37 : vector<8x8xf32> to vector<8x8xbf16>
    %cst_22 = arith.constant dense<0.000000e+00> : vector<8x8xf32>
    %39 = tpu.matmul %38, %26, %cst_22 {dimension_numbers = #tpu.dot_dimension_numbers<[1], [0], [0], [1], [0, 0, 1, 1], [], []>} : vector<8x8xbf16>, vector<8x8xbf16>, vector<8x8xf32> -> vector<8x8xf32>
    %40 = vector.extract_strided_slice %16 {offsets = [0, 8], sizes = [8, 8], strides = [1, 1]} : vector<8x32xbf16> to vector<8x8xbf16>
    %41 = vector.extract_strided_slice %17 {offsets = [0, 8], sizes = [8, 8], strides = [1, 1]} : vector<8x32xbf16> to vector<8x8xbf16>
    %42 = vector.extract_strided_slice %18 {offsets = [0, 8], sizes = [8, 8], strides = [1, 1]} : vector<8x32xbf16> to vector<8x8xbf16>
    %cst_23 = arith.constant dense<0.000000e+00> : vector<8x8xf32>
    %43 = tpu.matmul %40, %41, %cst_23 {dimension_numbers = #tpu.dot_dimension_numbers<[1], [1], [0], [0], [0, 0, 1, 0], [], []>} : vector<8x8xbf16>, vector<8x8xbf16>, vector<8x8xf32> -> vector<8x8xf32>
    %44 = arith.addf %43, %23 : vector<8x8xf32>
    %cst_24 = arith.constant dense<0xFF800000> : vector<8xf32>
    %45 = vector.multi_reduction <maximumf>, %44, %cst_24 [1] : vector<8x8xf32> to vector<8xf32>
    %46 = vector.shape_cast %45 : vector<8xf32> to vector<8x1xf32>
    %47 = vector.broadcast %46 : vector<8x1xf32> to vector<8x8xf32>
    %48 = arith.subf %44, %47 : vector<8x8xf32>
    %49 = math.exp %48 : vector<8x8xf32>
    %cst_25 = arith.constant dense<0.000000e+00> : vector<8xf32>
    %50 = vector.multi_reduction <add>, %49, %cst_25 [1] : vector<8x8xf32> to vector<8xf32>
    %51 = vector.shape_cast %50 : vector<8xf32> to vector<8x1xf32>
    %52 = vector.broadcast %51 : vector<8x1xf32> to vector<8x8xf32>
    %53 = arith.divf %49, %52 : vector<8x8xf32>
    %54 = arith.truncf %53 : vector<8x8xf32> to vector<8x8xbf16>
    %cst_26 = arith.constant dense<0.000000e+00> : vector<8x8xf32>
    %55 = tpu.matmul %54, %42, %cst_26 {dimension_numbers = #tpu.dot_dimension_numbers<[1], [0], [0], [1], [0, 0, 1, 1], [], []>} : vector<8x8xbf16>, vector<8x8xbf16>, vector<8x8xf32> -> vector<8x8xf32>
    %56 = vector.extract_strided_slice %16 {offsets = [0, 16], sizes = [8, 8], strides = [1, 1]} : vector<8x32xbf16> to vector<8x8xbf16>
    %57 = vector.extract_strided_slice %17 {offsets = [0, 16], sizes = [8, 8], strides = [1, 1]} : vector<8x32xbf16> to vector<8x8xbf16>
    %58 = vector.extract_strided_slice %18 {offsets = [0, 16], sizes = [8, 8], strides = [1, 1]} : vector<8x32xbf16> to vector<8x8xbf16>
    %cst_27 = arith.constant dense<0.000000e+00> : vector<8x8xf32>
    %59 = tpu.matmul %56, %57, %cst_27 {dimension_numbers = #tpu.dot_dimension_numbers<[1], [1], [0], [0], [0, 0, 1, 0], [], []>} : vector<8x8xbf16>, vector<8x8xbf16>, vector<8x8xf32> -> vector<8x8xf32>
    %60 = arith.addf %59, %23 : vector<8x8xf32>
    %cst_28 = arith.constant dense<0xFF800000> : vector<8xf32>
    %61 = vector.multi_reduction <maximumf>, %60, %cst_28 [1] : vector<8x8xf32> to vector<8xf32>
    %62 = vector.shape_cast %61 : vector<8xf32> to vector<8x1xf32>
    %63 = vector.broadcast %62 : vector<8x1xf32> to vector<8x8xf32>
    %64 = arith.subf %60, %63 : vector<8x8xf32>
    %65 = math.exp %64 : vector<8x8xf32>
    %cst_29 = arith.constant dense<0.000000e+00> : vector<8xf32>
    %66 = vector.multi_reduction <add>, %65, %cst_29 [1] : vector<8x8xf32> to vector<8xf32>
    %67 = vector.shape_cast %66 : vector<8xf32> to vector<8x1xf32>
    %68 = vector.broadcast %67 : vector<8x1xf32> to vector<8x8xf32>
    %69 = arith.divf %65, %68 : vector<8x8xf32>
    %70 = arith.truncf %69 : vector<8x8xf32> to vector<8x8xbf16>
    %cst_30 = arith.constant dense<0.000000e+00> : vector<8x8xf32>
    %71 = tpu.matmul %70, %58, %cst_30 {dimension_numbers = #tpu.dot_dimension_numbers<[1], [0], [0], [1], [0, 0, 1, 1], [], []>} : vector<8x8xbf16>, vector<8x8xbf16>, vector<8x8xf32> -> vector<8x8xf32>
    %72 = vector.extract_strided_slice %16 {offsets = [0, 24], sizes = [8, 8], strides = [1, 1]} : vector<8x32xbf16> to vector<8x8xbf16>
    %73 = vector.extract_strided_slice %17 {offsets = [0, 24], sizes = [8, 8], strides = [1, 1]} : vector<8x32xbf16> to vector<8x8xbf16>
    %74 = vector.extract_strided_slice %18 {offsets = [0, 24], sizes = [8, 8], strides = [1, 1]} : vector<8x32xbf16> to vector<8x8xbf16>
    %cst_31 = arith.constant dense<0.000000e+00> : vector<8x8xf32>
    %75 = tpu.matmul %72, %73, %cst_31 {dimension_numbers = #tpu.dot_dimension_numbers<[1], [1], [0], [0], [0, 0, 1, 0], [], []>} : vector<8x8xbf16>, vector<8x8xbf16>, vector<8x8xf32> -> vector<8x8xf32>
    %76 = arith.addf %75, %23 : vector<8x8xf32>
    %cst_32 = arith.constant dense<0xFF800000> : vector<8xf32>
    %77 = vector.multi_reduction <maximumf>, %76, %cst_32 [1] : vector<8x8xf32> to vector<8xf32>
    %78 = vector.shape_cast %77 : vector<8xf32> to vector<8x1xf32>
    %79 = vector.broadcast %78 : vector<8x1xf32> to vector<8x8xf32>
    %80 = arith.subf %76, %79 : vector<8x8xf32>
    %81 = math.exp %80 : vector<8x8xf32>
    %cst_33 = arith.constant dense<0.000000e+00> : vector<8xf32>
    %82 = vector.multi_reduction <add>, %81, %cst_33 [1] : vector<8x8xf32> to vector<8xf32>
    %83 = vector.shape_cast %82 : vector<8xf32> to vector<8x1xf32>
    %84 = vector.broadcast %83 : vector<8x1xf32> to vector<8x8xf32>
    %85 = arith.divf %81, %84 : vector<8x8xf32>
    %86 = arith.truncf %85 : vector<8x8xf32> to vector<8x8xbf16>
    %cst_34 = arith.constant dense<0.000000e+00> : vector<8x8xf32>
    %87 = tpu.matmul %86, %74, %cst_34 {dimension_numbers = #tpu.dot_dimension_numbers<[1], [0], [0], [1], [0, 0, 1, 1], [], []>} : vector<8x8xbf16>, vector<8x8xbf16>, vector<8x8xf32> -> vector<8x8xf32>
    %88 = tpu.concatenate %37, %53, %69, %85 in 1 : vector<8x8xf32>, vector<8x8xf32>, vector<8x8xf32>, vector<8x8xf32> -> vector<8x32xf32>
    %c0_35 = arith.constant 0 : index
    %c0_36 = arith.constant 0 : index
    %c0_37 = arith.constant 0 : index
    %89 = vector.load %arg22[%c0_35, %c0_36, %c0_37] : memref<1x8x32xf32, #tpu.memory_space<vmem>>, vector<1x8x32xf32>
    %90 = vector.shape_cast %89 : vector<1x8x32xf32> to vector<8x32xf32>
    %91 = vector.shape_cast %88 : vector<8x32xf32> to vector<1x8x32xf32>
    tpu.vector_store %arg22[%c0_35, %c0_36, %c0_37], %91 {strides = array<i32>} : memref<1x8x32xf32, #tpu.memory_space<vmem>>, vector<1x8x32xf32>,
    %92 = tpu.concatenate %39, %55, %71, %87 in 1 : vector<8x8xf32>, vector<8x8xf32>, vector<8x8xf32>, vector<8x8xf32> -> vector<8x32xf32>
    %93 = arith.truncf %92 : vector<8x32xf32> to vector<8x32xbf16>
    %c0_38 = arith.constant 0 : index
    %c0_39 = arith.constant 0 : index
    %94 = vector.load %arg8[%c0_38, %c0_39] : memref<32x32xbf16, #tpu.memory_space<vmem>>, vector<32x32xbf16>
    %cst_40 = arith.constant dense<0.000000e+00> : vector<8x32xf32>
    %95 = tpu.matmul %93, %94, %cst_40 {dimension_numbers = #tpu.dot_dimension_numbers<[1], [0], [0], [1], [0, 0, 1, 1], [], []>} : vector<8x32xbf16>, vector<32x32xbf16>, vector<8x32xf32> -> vector<8x32xf32>
    %96 = arith.addf %95, %1 : vector<8x32xf32>
    %c0_41 = arith.constant 0 : index
    %c0_42 = arith.constant 0 : index
    %97 = vector.load %arg9[%c0_41, %c0_42] : memref<1x32xf32, #tpu.memory_space<vmem>>, vector<1x32xf32>
    %c0_43 = arith.constant 0 : index
    %c0_44 = arith.constant 0 : index
    %98 = vector.load %arg10[%c0_43, %c0_44] : memref<1x32xf32, #tpu.memory_space<vmem>>, vector<1x32xf32>
    %cst_45 = arith.constant dense<0.000000e+00> : vector<8xf32>
    %99 = vector.multi_reduction <add>, %96, %cst_45 [1] : vector<8x32xf32> to vector<8xf32>
    %100 = vector.shape_cast %99 : vector<8xf32> to vector<8x1xf32>
    %cst_46 = arith.constant 3.200000e+01 : f32
    %101 = vector.broadcast %cst_46 : f32 to vector<8x1xf32>
    %102 = arith.divf %100, %101 : vector<8x1xf32>
    %103 = arith.mulf %96, %96 : vector<8x32xf32>
    %cst_47 = arith.constant dense<0.000000e+00> : vector<8xf32>
    %104 = vector.multi_reduction <add>, %103, %cst_47 [1] : vector<8x32xf32> to vector<8xf32>
    %105 = vector.shape_cast %104 : vector<8xf32> to vector<8x1xf32>
    %cst_48 = arith.constant 3.200000e+01 : f32
    %106 = vector.broadcast %cst_48 : f32 to vector<8x1xf32>
    %107 = arith.divf %105, %106 : vector<8x1xf32>
    %108 = arith.mulf %102, %102 : vector<8x1xf32>
    %109 = arith.subf %107, %108 : vector<8x1xf32>
    %110 = vector.broadcast %102 : vector<8x1xf32> to vector<8x32xf32>
    %111 = arith.subf %96, %110 : vector<8x32xf32>
    %cst_49 = arith.constant 9.99999974E-6 : f32
    %112 = vector.broadcast %cst_49 : f32 to vector<8x1xf32>
    %113 = arith.addf %109, %112 : vector<8x1xf32>
    %114 = math.rsqrt %113 : vector<8x1xf32>
    %115 = vector.broadcast %114 : vector<8x1xf32> to vector<8x32xf32>
    %116 = arith.mulf %111, %115 : vector<8x32xf32>
    %117 = vector.broadcast %97 : vector<1x32xf32> to vector<8x32xf32>
    %118 = arith.mulf %116, %117 : vector<8x32xf32>
    %119 = vector.broadcast %98 : vector<1x32xf32> to vector<8x32xf32>
    %120 = arith.addf %118, %119 : vector<8x32xf32>
    %c0_50 = arith.constant 0 : index
    %c0_51 = arith.constant 0 : index
    %c0_52 = arith.constant 0 : index
    %121 = vector.load %arg4[%c0_50, %c0_51, %c0_52] : memref<1x8x8xi32, #tpu.memory_space<vmem>>, vector<1x8x8xi32>
    %122 = vector.shape_cast %121 : vector<1x8x8xi32> to vector<8x8xi32>
    %123 = arith.truncf %120 : vector<8x32xf32> to vector<8x32xbf16>
    %124 = arith.truncf %3 : vector<8x32xf32> to vector<8x32xbf16>
    %c0_53 = arith.constant 0 : index
    %c0_54 = arith.constant 0 : index
    %125 = vector.load %arg11[%c0_53, %c0_54] : memref<32x32xbf16, #tpu.memory_space<vmem>>, vector<32x32xbf16>
    %cst_55 = arith.constant dense<0.000000e+00> : vector<8x32xf32>
    %126 = tpu.matmul %123, %125, %cst_55 {dimension_numbers = #tpu.dot_dimension_numbers<[1], [0], [0], [1], [0, 0, 1, 1], [], []>} : vector<8x32xbf16>, vector<32x32xbf16>, vector<8x32xf32> -> vector<8x32xf32>
    %cst_56 = arith.constant 0.353553385 : f32
    %127 = vector.broadcast %cst_56 : f32 to vector<8x32xf32>
    %128 = arith.mulf %126, %127 : vector<8x32xf32>
    %c0_57 = arith.constant 0 : index
    %c0_58 = arith.constant 0 : index
    %129 = vector.load %arg12[%c0_57, %c0_58] : memref<32x32xbf16, #tpu.memory_space<vmem>>, vector<32x32xbf16>
    %cst_59 = arith.constant dense<0.000000e+00> : vector<8x32xf32>
    %130 = tpu.matmul %124, %129, %cst_59 {dimension_numbers = #tpu.dot_dimension_numbers<[1], [0], [0], [1], [0, 0, 1, 1], [], []>} : vector<8x32xbf16>, vector<32x32xbf16>, vector<8x32xf32> -> vector<8x32xf32>
    %c0_60 = arith.constant 0 : index
    %c0_61 = arith.constant 0 : index
    %131 = vector.load %arg13[%c0_60, %c0_61] : memref<32x32xbf16, #tpu.memory_space<vmem>>, vector<32x32xbf16>
    %cst_62 = arith.constant dense<0.000000e+00> : vector<8x32xf32>
    %132 = tpu.matmul %124, %131, %cst_62 {dimension_numbers = #tpu.dot_dimension_numbers<[1], [0], [0], [1], [0, 0, 1, 1], [], []>} : vector<8x32xbf16>, vector<32x32xbf16>, vector<8x32xf32> -> vector<8x32xf32>
    %133 = arith.truncf %128 : vector<8x32xf32> to vector<8x32xbf16>
    %134 = arith.truncf %130 : vector<8x32xf32> to vector<8x32xbf16>
    %135 = arith.truncf %132 : vector<8x32xf32> to vector<8x32xbf16>
    %c0_i32_63 = arith.constant 0 : i32
    %136 = vector.broadcast %c0_i32_63 : i32 to vector<8x8xi32>
    %137 = arith.cmpi ne, %122, %136 : vector<8x8xi32>
    %cst_64 = arith.constant -1.000000e+09 : f32
    %cst_65 = arith.constant 0.000000e+00 : f32
    %138 = vector.broadcast %cst_64 : f32 to vector<8x8xf32>
    %139 = vector.broadcast %cst_65 : f32 to vector<8x8xf32>
    %140 = arith.select %137, %138, %139 : vector<8x8xi1>, vector<8x8xf32>
    %141 = vector.extract_strided_slice %133 {offsets = [0, 0], sizes = [8, 8], strides = [1, 1]} : vector<8x32xbf16> to vector<8x8xbf16>
    %142 = vector.extract_strided_slice %134 {offsets = [0, 0], sizes = [8, 8], strides = [1, 1]} : vector<8x32xbf16> to vector<8x8xbf16>
    %143 = vector.extract_strided_slice %135 {offsets = [0, 0], sizes = [8, 8], strides = [1, 1]} : vector<8x32xbf16> to vector<8x8xbf16>
    %cst_66 = arith.constant dense<0.000000e+00> : vector<8x8xf32>
    %144 = tpu.matmul %141, %142, %cst_66 {dimension_numbers = #tpu.dot_dimension_numbers<[1], [1], [0], [0], [0, 0, 1, 0], [], []>} : vector<8x8xbf16>, vector<8x8xbf16>, vector<8x8xf32> -> vector<8x8xf32>
    %145 = arith.addf %144, %140 : vector<8x8xf32>
    %cst_67 = arith.constant dense<0xFF800000> : vector<8xf32>
    %146 = vector.multi_reduction <maximumf>, %145, %cst_67 [1] : vector<8x8xf32> to vector<8xf32>
    %147 = vector.shape_cast %146 : vector<8xf32> to vector<8x1xf32>
    %148 = vector.broadcast %147 : vector<8x1xf32> to vector<8x8xf32>
    %149 = arith.subf %145, %148 : vector<8x8xf32>
    %150 = math.exp %149 : vector<8x8xf32>
    %cst_68 = arith.constant dense<0.000000e+00> : vector<8xf32>
    %151 = vector.multi_reduction <add>, %150, %cst_68 [1] : vector<8x8xf32> to vector<8xf32>
    %152 = vector.shape_cast %151 : vector<8xf32> to vector<8x1xf32>
    %153 = vector.broadcast %152 : vector<8x1xf32> to vector<8x8xf32>
    %154 = arith.divf %150, %153 : vector<8x8xf32>
    %155 = arith.truncf %154 : vector<8x8xf32> to vector<8x8xbf16>
    %cst_69 = arith.constant dense<0.000000e+00> : vector<8x8xf32>
    %156 = tpu.matmul %155, %143, %cst_69 {dimension_numbers = #tpu.dot_dimension_numbers<[1], [0], [0], [1], [0, 0, 1, 1], [], []>} : vector<8x8xbf16>, vector<8x8xbf16>, vector<8x8xf32> -> vector<8x8xf32>
    %157 = vector.extract_strided_slice %133 {offsets = [0, 8], sizes = [8, 8], strides = [1, 1]} : vector<8x32xbf16> to vector<8x8xbf16>
    %158 = vector.extract_strided_slice %134 {offsets = [0, 8], sizes = [8, 8], strides = [1, 1]} : vector<8x32xbf16> to vector<8x8xbf16>
    %159 = vector.extract_strided_slice %135 {offsets = [0, 8], sizes = [8, 8], strides = [1, 1]} : vector<8x32xbf16> to vector<8x8xbf16>
    %cst_70 = arith.constant dense<0.000000e+00> : vector<8x8xf32>
    %160 = tpu.matmul %157, %158, %cst_70 {dimension_numbers = #tpu.dot_dimension_numbers<[1], [1], [0], [0], [0, 0, 1, 0], [], []>} : vector<8x8xbf16>, vector<8x8xbf16>, vector<8x8xf32> -> vector<8x8xf32>
    %161 = arith.addf %160, %140 : vector<8x8xf32>
    %cst_71 = arith.constant dense<0xFF800000> : vector<8xf32>
    %162 = vector.multi_reduction <maximumf>, %161, %cst_71 [1] : vector<8x8xf32> to vector<8xf32>
    %163 = vector.shape_cast %162 : vector<8xf32> to vector<8x1xf32>
    %164 = vector.broadcast %163 : vector<8x1xf32> to vector<8x8xf32>
    %165 = arith.subf %161, %164 : vector<8x8xf32>
    %166 = math.exp %165 : vector<8x8xf32>
    %cst_72 = arith.constant dense<0.000000e+00> : vector<8xf32>
    %167 = vector.multi_reduction <add>, %166, %cst_72 [1] : vector<8x8xf32> to vector<8xf32>
    %168 = vector.shape_cast %167 : vector<8xf32> to vector<8x1xf32>
    %169 = vector.broadcast %168 : vector<8x1xf32> to vector<8x8xf32>
    %170 = arith.divf %166, %169 : vector<8x8xf32>
    %171 = arith.truncf %170 : vector<8x8xf32> to vector<8x8xbf16>
    %cst_73 = arith.constant dense<0.000000e+00> : vector<8x8xf32>
    %172 = tpu.matmul %171, %159, %cst_73 {dimension_numbers = #tpu.dot_dimension_numbers<[1], [0], [0], [1], [0, 0, 1, 1], [], []>} : vector<8x8xbf16>, vector<8x8xbf16>, vector<8x8xf32> -> vector<8x8xf32>
    %173 = vector.extract_strided_slice %133 {offsets = [0, 16], sizes = [8, 8], strides = [1, 1]} : vector<8x32xbf16> to vector<8x8xbf16>
    %174 = vector.extract_strided_slice %134 {offsets = [0, 16], sizes = [8, 8], strides = [1, 1]} : vector<8x32xbf16> to vector<8x8xbf16>
    %175 = vector.extract_strided_slice %135 {offsets = [0, 16], sizes = [8, 8], strides = [1, 1]} : vector<8x32xbf16> to vector<8x8xbf16>
    %cst_74 = arith.constant dense<0.000000e+00> : vector<8x8xf32>
    %176 = tpu.matmul %173, %174, %cst_74 {dimension_numbers = #tpu.dot_dimension_numbers<[1], [1], [0], [0], [0, 0, 1, 0], [], []>} : vector<8x8xbf16>, vector<8x8xbf16>, vector<8x8xf32> -> vector<8x8xf32>
    %177 = arith.addf %176, %140 : vector<8x8xf32>
    %cst_75 = arith.constant dense<0xFF800000> : vector<8xf32>
    %178 = vector.multi_reduction <maximumf>, %177, %cst_75 [1] : vector<8x8xf32> to vector<8xf32>
    %179 = vector.shape_cast %178 : vector<8xf32> to vector<8x1xf32>
    %180 = vector.broadcast %179 : vector<8x1xf32> to vector<8x8xf32>
    %181 = arith.subf %177, %180 : vector<8x8xf32>
    %182 = math.exp %181 : vector<8x8xf32>
    %cst_76 = arith.constant dense<0.000000e+00> : vector<8xf32>
    %183 = vector.multi_reduction <add>, %182, %cst_76 [1] : vector<8x8xf32> to vector<8xf32>
    %184 = vector.shape_cast %183 : vector<8xf32> to vector<8x1xf32>
    %185 = vector.broadcast %184 : vector<8x1xf32> to vector<8x8xf32>
    %186 = arith.divf %182, %185 : vector<8x8xf32>
    %187 = arith.truncf %186 : vector<8x8xf32> to vector<8x8xbf16>
    %cst_77 = arith.constant dense<0.000000e+00> : vector<8x8xf32>
    %188 = tpu.matmul %187, %175, %cst_77 {dimension_numbers = #tpu.dot_dimension_numbers<[1], [0], [0], [1], [0, 0, 1, 1], [], []>} : vector<8x8xbf16>, vector<8x8xbf16>, vector<8x8xf32> -> vector<8x8xf32>
    %189 = vector.extract_strided_slice %133 {offsets = [0, 24], sizes = [8, 8], strides = [1, 1]} : vector<8x32xbf16> to vector<8x8xbf16>
    %190 = vector.extract_strided_slice %134 {offsets = [0, 24], sizes = [8, 8], strides = [1, 1]} : vector<8x32xbf16> to vector<8x8xbf16>
    %191 = vector.extract_strided_slice %135 {offsets = [0, 24], sizes = [8, 8], strides = [1, 1]} : vector<8x32xbf16> to vector<8x8xbf16>
    %cst_78 = arith.constant dense<0.000000e+00> : vector<8x8xf32>
    %192 = tpu.matmul %189, %190, %cst_78 {dimension_numbers = #tpu.dot_dimension_numbers<[1], [1], [0], [0], [0, 0, 1, 0], [], []>} : vector<8x8xbf16>, vector<8x8xbf16>, vector<8x8xf32> -> vector<8x8xf32>
    %193 = arith.addf %192, %140 : vector<8x8xf32>
    %cst_79 = arith.constant dense<0xFF800000> : vector<8xf32>
    %194 = vector.multi_reduction <maximumf>, %193, %cst_79 [1] : vector<8x8xf32> to vector<8xf32>
    %195 = vector.shape_cast %194 : vector<8xf32> to vector<8x1xf32>
    %196 = vector.broadcast %195 : vector<8x1xf32> to vector<8x8xf32>
    %197 = arith.subf %193, %196 : vector<8x8xf32>
    %198 = math.exp %197 : vector<8x8xf32>
    %cst_80 = arith.constant dense<0.000000e+00> : vector<8xf32>
    %199 = vector.multi_reduction <add>, %198, %cst_80 [1] : vector<8x8xf32> to vector<8xf32>
    %200 = vector.shape_cast %199 : vector<8xf32> to vector<8x1xf32>
    %201 = vector.broadcast %200 : vector<8x1xf32> to vector<8x8xf32>
    %202 = arith.divf %198, %201 : vector<8x8xf32>
    %203 = arith.truncf %202 : vector<8x8xf32> to vector<8x8xbf16>
    %cst_81 = arith.constant dense<0.000000e+00> : vector<8x8xf32>
    %204 = tpu.matmul %203, %191, %cst_81 {dimension_numbers = #tpu.dot_dimension_numbers<[1], [0], [0], [1], [0, 0, 1, 1], [], []>} : vector<8x8xbf16>, vector<8x8xbf16>, vector<8x8xf32> -> vector<8x8xf32>
    %205 = tpu.concatenate %154, %170, %186, %202 in 1 : vector<8x8xf32>, vector<8x8xf32>, vector<8x8xf32>, vector<8x8xf32> -> vector<8x32xf32>
    %c0_82 = arith.constant 0 : index
    %c0_83 = arith.constant 0 : index
    %c0_84 = arith.constant 0 : index
    %206 = vector.load %arg23[%c0_82, %c0_83, %c0_84] : memref<1x8x32xf32, #tpu.memory_space<vmem>>, vector<1x8x32xf32>
    %207 = vector.shape_cast %206 : vector<1x8x32xf32> to vector<8x32xf32>
    %208 = vector.shape_cast %205 : vector<8x32xf32> to vector<1x8x32xf32>
    tpu.vector_store %arg23[%c0_82, %c0_83, %c0_84], %208 {strides = array<i32>} : memref<1x8x32xf32, #tpu.memory_space<vmem>>, vector<1x8x32xf32>,
    %209 = tpu.concatenate %156, %172, %188, %204 in 1 : vector<8x8xf32>, vector<8x8xf32>, vector<8x8xf32>, vector<8x8xf32> -> vector<8x32xf32>
    %210 = arith.truncf %209 : vector<8x32xf32> to vector<8x32xbf16>
    %c0_85 = arith.constant 0 : index
    %c0_86 = arith.constant 0 : index
    %211 = vector.load %arg14[%c0_85, %c0_86] : memref<32x32xbf16, #tpu.memory_space<vmem>>, vector<32x32xbf16>
    %cst_87 = arith.constant dense<0.000000e+00> : vector<8x32xf32>
    %212 = tpu.matmul %210, %211, %cst_87 {dimension_numbers = #tpu.dot_dimension_numbers<[1], [0], [0], [1], [0, 0, 1, 1], [], []>} : vector<8x32xbf16>, vector<32x32xbf16>, vector<8x32xf32> -> vector<8x32xf32>
    %213 = arith.addf %212, %120 : vector<8x32xf32>
    %c0_88 = arith.constant 0 : index
    %c0_89 = arith.constant 0 : index
    %214 = vector.load %arg15[%c0_88, %c0_89] : memref<1x32xf32, #tpu.memory_space<vmem>>, vector<1x32xf32>
    %c0_90 = arith.constant 0 : index
    %c0_91 = arith.constant 0 : index
    %215 = vector.load %arg16[%c0_90, %c0_91] : memref<1x32xf32, #tpu.memory_space<vmem>>, vector<1x32xf32>
    %cst_92 = arith.constant dense<0.000000e+00> : vector<8xf32>
    %216 = vector.multi_reduction <add>, %213, %cst_92 [1] : vector<8x32xf32> to vector<8xf32>
    %217 = vector.shape_cast %216 : vector<8xf32> to vector<8x1xf32>
    %cst_93 = arith.constant 3.200000e+01 : f32
    %218 = vector.broadcast %cst_93 : f32 to vector<8x1xf32>
    %219 = arith.divf %217, %218 : vector<8x1xf32>
    %220 = arith.mulf %213, %213 : vector<8x32xf32>
    %cst_94 = arith.constant dense<0.000000e+00> : vector<8xf32>
    %221 = vector.multi_reduction <add>, %220, %cst_94 [1] : vector<8x32xf32> to vector<8xf32>
    %222 = vector.shape_cast %221 : vector<8xf32> to vector<8x1xf32>
    %cst_95 = arith.constant 3.200000e+01 : f32
    %223 = vector.broadcast %cst_95 : f32 to vector<8x1xf32>
    %224 = arith.divf %222, %223 : vector<8x1xf32>
    %225 = arith.mulf %219, %219 : vector<8x1xf32>
    %226 = arith.subf %224, %225 : vector<8x1xf32>
    %227 = vector.broadcast %219 : vector<8x1xf32> to vector<8x32xf32>
    %228 = arith.subf %213, %227 : vector<8x32xf32>
    %cst_96 = arith.constant 9.99999974E-6 : f32
    %229 = vector.broadcast %cst_96 : f32 to vector<8x1xf32>
    %230 = arith.addf %226, %229 : vector<8x1xf32>
    %231 = math.rsqrt %230 : vector<8x1xf32>
    %232 = vector.broadcast %231 : vector<8x1xf32> to vector<8x32xf32>
    %233 = arith.mulf %228, %232 : vector<8x32xf32>
    %234 = vector.broadcast %214 : vector<1x32xf32> to vector<8x32xf32>
    %235 = arith.mulf %233, %234 : vector<8x32xf32>
    %236 = vector.broadcast %215 : vector<1x32xf32> to vector<8x32xf32>
    %237 = arith.addf %235, %236 : vector<8x32xf32>
    %238 = arith.truncf %237 : vector<8x32xf32> to vector<8x32xbf16>
    %c0_97 = arith.constant 0 : index
    %c0_98 = arith.constant 0 : index
    %239 = vector.load %arg17[%c0_97, %c0_98] : memref<32x64xbf16, #tpu.memory_space<vmem>>, vector<32x64xbf16>
    %cst_99 = arith.constant dense<0.000000e+00> : vector<8x64xf32>
    %240 = tpu.matmul %238, %239, %cst_99 {dimension_numbers = #tpu.dot_dimension_numbers<[1], [0], [0], [1], [0, 0, 1, 1], [], []>} : vector<8x32xbf16>, vector<32x64xbf16>, vector<8x64xf32> -> vector<8x64xf32>
    %cst_100 = arith.constant 0.000000e+00 : f32
    %241 = vector.broadcast %cst_100 : f32 to vector<8x64xf32>
    %242 = arith.maximumf %240, %241 : vector<8x64xf32>
    %243 = arith.truncf %242 : vector<8x64xf32> to vector<8x64xbf16>
    %c0_101 = arith.constant 0 : index
    %c0_102 = arith.constant 0 : index
    %244 = vector.load %arg18[%c0_101, %c0_102] : memref<64x32xbf16, #tpu.memory_space<vmem>>, vector<64x32xbf16>
    %cst_103 = arith.constant dense<0.000000e+00> : vector<8x32xf32>
    %245 = tpu.matmul %243, %244, %cst_103 {dimension_numbers = #tpu.dot_dimension_numbers<[1], [0], [0], [1], [0, 0, 1, 1], [], []>} : vector<8x64xbf16>, vector<64x32xbf16>, vector<8x32xf32> -> vector<8x32xf32>
    %246 = arith.addf %245, %237 : vector<8x32xf32>
    %c0_104 = arith.constant 0 : index
    %c0_105 = arith.constant 0 : index
    %247 = vector.load %arg19[%c0_104, %c0_105] : memref<1x32xf32, #tpu.memory_space<vmem>>, vector<1x32xf32>
    %c0_106 = arith.constant 0 : index
    %c0_107 = arith.constant 0 : index
    %248 = vector.load %arg20[%c0_106, %c0_107] : memref<1x32xf32, #tpu.memory_space<vmem>>, vector<1x32xf32>
    %cst_108 = arith.constant dense<0.000000e+00> : vector<8xf32>
    %249 = vector.multi_reduction <add>, %246, %cst_108 [1] : vector<8x32xf32> to vector<8xf32>
    %250 = vector.shape_cast %249 : vector<8xf32> to vector<8x1xf32>
    %cst_109 = arith.constant 3.200000e+01 : f32
    %251 = vector.broadcast %cst_109 : f32 to vector<8x1xf32>
    %252 = arith.divf %250, %251 : vector<8x1xf32>
    %253 = arith.mulf %246, %246 : vector<8x32xf32>
    %cst_110 = arith.constant dense<0.000000e+00> : vector<8xf32>
    %254 = vector.multi_reduction <add>, %253, %cst_110 [1] : vector<8x32xf32> to vector<8xf32>
    %255 = vector.shape_cast %254 : vector<8xf32> to vector<8x1xf32>
    %cst_111 = arith.constant 3.200000e+01 : f32
    %256 = vector.broadcast %cst_111 : f32 to vector<8x1xf32>
    %257 = arith.divf %255, %256 : vector<8x1xf32>
    %258 = arith.mulf %252, %252 : vector<8x1xf32>
    %259 = arith.subf %257, %258 : vector<8x1xf32>
    %260 = vector.broadcast %252 : vector<8x1xf32> to vector<8x32xf32>
    %261 = arith.subf %246, %260 : vector<8x32xf32>
    %cst_112 = arith.constant 9.99999974E-6 : f32
    %262 = vector.broadcast %cst_112 : f32 to vector<8x1xf32>
    %263 = arith.addf %259, %262 : vector<8x1xf32>
    %264 = math.rsqrt %263 : vector<8x1xf32>
    %265 = vector.broadcast %264 : vector<8x1xf32> to vector<8x32xf32>
    %266 = arith.mulf %261, %265 : vector<8x32xf32>
    %267 = vector.broadcast %247 : vector<1x32xf32> to vector<8x32xf32>
    %268 = arith.mulf %266, %267 : vector<8x32xf32>
    %269 = vector.broadcast %248 : vector<1x32xf32> to vector<8x32xf32>
    %270 = arith.addf %268, %269 : vector<8x32xf32>
    %c0_113 = arith.constant 0 : index
    %c0_114 = arith.constant 0 : index
    %c0_115 = arith.constant 0 : index
    %271 = vector.load %arg21[%c0_113, %c0_114, %c0_115] : memref<1x8x32xf32, #tpu.memory_space<vmem>>, vector<1x8x32xf32>
    %272 = vector.shape_cast %271 : vector<1x8x32xf32> to vector<8x32xf32>
    %273 = vector.shape_cast %270 : vector<8x32xf32> to vector<1x8x32xf32>
    tpu.vector_store %arg21[%c0_113, %c0_114, %c0_115], %273 {strides = array<i32>} : memref<1x8x32xf32, #tpu.memory_space<vmem>>, vector<1x8x32xf32>,
    return
  }
  func.func @transform_0(%arg0: i32) -> (i32, i32, i32) {
    %c0_i32 = arith.constant 0 : i32
    %c0_i32_0 = arith.constant 0 : i32
    %c0_i32_1 = arith.constant 0 : i32
    return %arg0, %c0_i32, %c0_i32_0 : i32, i32, i32
  }
  func.func @transform_1(%arg0: i32) -> (i32, i32, i32) {
    %c0_i32 = arith.constant 0 : i32
    %c0_i32_0 = arith.constant 0 : i32
    %c0_i32_1 = arith.constant 0 : i32
    return %arg0, %c0_i32, %c0_i32_0 : i32, i32, i32
  }
  func.func @transform_2(%arg0: i32) -> (i32, i32, i32) {
    %c0_i32 = arith.constant 0 : i32
    %c0_i32_0 = arith.constant 0 : i32
    %c0_i32_1 = arith.constant 0 : i32
    return %arg0, %c0_i32, %c0_i32_0 : i32, i32, i32
  }
  func.func @transform_3(%arg0: i32) -> (i32, i32, i32) {
    %c0_i32 = arith.constant 0 : i32
    %c0_i32_0 = arith.constant 0 : i32
    %c0_i32_1 = arith.constant 0 : i32
    return %arg0, %c0_i32, %c0_i32_0 : i32, i32, i32
  }
  func.func @transform_4(%arg0: i32) -> (i32, i32) {
    %c0_i32 = arith.constant 0 : i32
    %c0_i32_0 = arith.constant 0 : i32
    %c0_i32_1 = arith.constant 0 : i32
    return %c0_i32, %c0_i32_0 : i32, i32
  }
  func.func @transform_5(%arg0: i32) -> (i32, i32) {
    %c0_i32 = arith.constant 0 : i32
    %c0_i32_0 = arith.constant 0 : i32
    %c0_i32_1 = arith.constant 0 : i32
    return %c0_i32, %c0_i32_0 : i32, i32
  }
  func.func @transform_6(%arg0: i32) -> (i32, i32) {
    %c0_i32 = arith.constant 0 : i32
    %c0_i32_0 = arith.constant 0 : i32
    %c0_i32_1 = arith.constant 0 : i32
    return %c0_i32, %c0_i32_0 : i32, i32
  }
  func.func @transform_7(%arg0: i32) -> (i32, i32) {
    %c0_i32 = arith.constant 0 : i32
    %c0_i32_0 = arith.constant 0 : i32
    %c0_i32_1 = arith.constant 0 : i32
    return %c0_i32, %c0_i32_0 : i32, i32
  }
  func.func @transform_8(%arg0: i32) -> (i32, i32) {
    %c0_i32 = arith.constant 0 : i32
    %c0_i32_0 = arith.constant 0 : i32
    %c0_i32_1 = arith.constant 0 : i32
    return %c0_i32, %c0_i32_0 : i32, i32
  }
  func.func @transform_9(%arg0: i32) -> (i32, i32) {
    %c0_i32 = arith.constant 0 : i32
    %c0_i32_0 = arith.constant 0 : i32
    %c0_i32_1 = arith.constant 0 : i32
    return %c0_i32, %c0_i32_0 : i32, i32
  }
  func.func @transform_10(%arg0: i32) -> (i32, i32) {
    %c0_i32 = arith.constant 0 : i32
    %c0_i32_0 = arith.constant 0 : i32
    %c0_i32_1 = arith.constant 0 : i32
    return %c0_i32, %c0_i32_0 : i32, i32
  }
  func.func @transform_11(%arg0: i32) -> (i32, i32) {
    %c0_i32 = arith.constant 0 : i32
    %c0_i32_0 = arith.constant 0 : i32
    %c0_i32_1 = arith.constant 0 : i32
    return %c0_i32, %c0_i32_0 : i32, i32
  }
  func.func @transform_12(%arg0: i32) -> (i32, i32) {
    %c0_i32 = arith.constant 0 : i32
    %c0_i32_0 = arith.constant 0 : i32
    %c0_i32_1 = arith.constant 0 : i32
    return %c0_i32, %c0_i32_0 : i32, i32
  }
  func.func @transform_13(%arg0: i32) -> (i32, i32) {
    %c0_i32 = arith.constant 0 : i32
    %c0_i32_0 = arith.constant 0 : i32
    %c0_i32_1 = arith.constant 0 : i32
    return %c0_i32, %c0_i32_0 : i32, i32
  }
  func.func @transform_14(%arg0: i32) -> (i32, i32) {
    %c0_i32 = arith.constant 0 : i32
    %c0_i32_0 = arith.constant 0 : i32
    %c0_i32_1 = arith.constant 0 : i32
    return %c0_i32, %c0_i32_0 : i32, i32
  }
  func.func @transform_15(%arg0: i32) -> (i32, i32) {
    %c0_i32 = arith.constant 0 : i32
    %c0_i32_0 = arith.constant 0 : i32
    %c0_i32_1 = arith.constant 0 : i32
    return %c0_i32, %c0_i32_0 : i32, i32
  }
  func.func @transform_16(%arg0: i32) -> (i32, i32) {
    %c0_i32 = arith.constant 0 : i32
    %c0_i32_0 = arith.constant 0 : i32
    %c0_i32_1 = arith.constant 0 : i32
    return %c0_i32, %c0_i32_0 : i32, i32
  }
  func.func @transform_17(%arg0: i32) -> (i32, i32) {
    %c0_i32 = arith.constant 0 : i32
    %c0_i32_0 = arith.constant 0 : i32
    %c0_i32_1 = arith.constant 0 : i32
    return %c0_i32, %c0_i32_0 : i32, i32
  }
  func.func @transform_18(%arg0: i32) -> (i32, i32) {
    %c0_i32 = arith.constant 0 : i32
    %c0_i32_0 = arith.constant 0 : i32
    %c0_i32_1 = arith.constant 0 : i32
    return %c0_i32, %c0_i32_0 : i32, i32
  }
  func.func @transform_19(%arg0: i32) -> (i32, i32) {
    %c0_i32 = arith.constant 0 : i32
    %c0_i32_0 = arith.constant 0 : i32
    %c0_i32_1 = arith.constant 0 : i32
    return %c0_i32, %c0_i32_0 : i32, i32
  }
  func.func @transform_20(%arg0: i32) -> (i32, i32, i32) {
    %c0_i32 = arith.constant 0 : i32
    %c0_i32_0 = arith.constant 0 : i32
    %c0_i32_1 = arith.constant 0 : i32
    return %arg0, %c0_i32, %c0_i32_0 : i32, i32, i32
  }
  func.func @transform_21(%arg0: i32) -> (i32, i32, i32) {
    %c0_i32 = arith.constant 0 : i32
    %c0_i32_0 = arith.constant 0 : i32
    %c0_i32_1 = arith.constant 0 : i32
    return %arg0, %c0_i32, %c0_i32_0 : i32, i32, i32
  }
  func.func @transform_22(%arg0: i32) -> (i32, i32, i32) {
    %c0_i32 = arith.constant 0 : i32
    %c0_i32_0 = arith.constant 0 : i32
    %c0_i32_1 = arith.constant 0 : i32
    return %arg0, %c0_i32, %c0_i32_0 : i32, i32, i32
  }
}

</mosaic_0001>

<bundles_post_ra>
// kernel: tpu_custom_call.1
= control target key start
LH: loop header
LB: loop body
LE: loop exit
PB: predicated region body
PF: predicated region fallthrough
CT: control target
= control target key end

     0   :  { %s4088_s0 = inlined_call_operand.vmem [shape: f32[2,8,32], index: 0, kind: input, shape index: {}]   ;;  %s4089_s1 = inlined_call_operand.vmem [shape: f32[2,8,32], index: 1, kind: input, shape index: {}]   ;;  %s4090_s2 = inlined_call_operand.vmem [shape: s32[2,8,8], index: 2, kind: input, shape index: {}]   ;;  %s4091_s3 = inlined_call_operand.hbm [shape: s32[2,8,8], index: 3, kind: input, shape index: {}]   ;;  %s4092_s4 = inlined_call_operand.hbm [shape: bf16[32,32], index: 4, kind: input, shape index: {}]   ;;  %s4093_s5 = inlined_call_operand.hbm [shape: bf16[32,32], index: 5, kind: input, shape index: {}]   ;;  %s4094_s6 = inlined_call_operand.hbm [shape: bf16[32,32], index: 6, kind: input, shape index: {}]   ;;  %s4095_s7 = inlined_call_operand.hbm [shape: bf16[32,32], index: 7, kind: input, shape index: {}]   ;;  %s4096_s8 = inlined_call_operand.hbm [shape: f32[1,32], index: 8, kind: input, shape index: {}]   ;;  %s4097_s9 = inlined_call_operand.hbm [shape: f32[1,32], index: 9, kind: input, shape index: {}]   ;;  %s4098_s10 = inlined_call_operand.hbm [shape: bf16[32,32], index: 10, kind: input, shape index: {}]   ;;  %s4099_s11 = inlined_call_operand.hbm [shape: bf16[32,32], index: 11, kind: input, shape index: {}]   ;;  %s4100_s12 = inlined_call_operand.hbm [shape: bf16[32,32], index: 12, kind: input, shape index: {}]   ;;  %s4101_s13 = inlined_call_operand.hbm [shape: bf16[32,32], index: 13, kind: input, shape index: {}]   ;;  %s4102_s14 = inlined_call_operand.hbm [shape: f32[1,32], index: 14, kind: input, shape index: {}]   ;;  %s4103_s15 = inlined_call_operand.hbm [shape: f32[1,32], index: 15, kind: input, shape index: {}]   ;;  %s4104_s16 = inlined_call_operand.hbm [shape: bf16[32,64], index: 16, kind: input, shape index: {}]   ;;  %s4105_s17 = inlined_call_operand.vmem [shape: bf16[64,32], index: 17, kind: input, shape index: {}]   ;;  %s4106_s18 = inlined_call_operand.vmem [shape: f32[1,32], index: 18, kind: input, shape index: {}]   ;;  %s4107_s19 = inlined_call_operand.vmem [shape: f32[1,32], index: 19, kind: input, shape index: {}]   ;;  %s4108_s20 = inlined_call_operand.hbm [shape: f32[2,8,32], index: 20, kind: output, shape index: {0}]   ;;  %s4109_s21 = inlined_call_operand.hbm [shape: f32[2,8,32], index: 21, kind: output, shape index: {1}]   ;;  %s4110_s22 = inlined_call_operand.hbm [shape: f32[2,8,32], index: 22, kind: output, shape index: {2}]  }
   0x1   :  { %4120 = sst [smem:[#allocation39_spill]] %s4088_s0 }
   0x2   :  { %4121 = sst [smem:[#allocation40_spill]] %s4089_s1 }
   0x3   :  { %4122 = sst [smem:[#allocation41_spill]] %s4090_s2 }
   0x4   :  { %4123 = sst [smem:[#allocation42_spill]] %s4091_s3 }
   0x5   :  { %4124 = sst [smem:[#allocation43_spill]] %s4092_s4 }
   0x6   :  { %4125 = sst [smem:[#allocation44_spill]] %s4093_s5 }
   0x7   :  { %4126 = sst [smem:[#allocation45_spill]] %s4094_s6 }
   0x8   :  { %4127 = sst [smem:[#allocation46_spill]] %s4095_s7 }
   0x9   :  { %4128 = sst [smem:[#allocation47_spill]] %s4096_s8 }
   0xa   :  { %4129 = sst [smem:[#allocation48_spill]] %s4097_s9 }
   0xb   :  { %4130 = sst [smem:[#allocation49_spill]] %s4098_s10 }
   0xc   :  { %4131 = sst [smem:[#allocation50_spill]] %s4099_s11 }
   0xd   :  { %4132 = sst [smem:[#allocation51_spill]] %s4100_s12 }
   0xe   :  { %4133 = sst [smem:[#allocation52_spill]] %s4101_s13 }
   0xf   :  { %4134 = sst [smem:[#allocation53_spill]] %s4102_s14 }
  0x10   :  { %4135 = sst [smem:[#allocation54_spill]] %s4105_s17 }
  0x11   :  { %4136 = sst [smem:[#allocation55_spill]] %s4106_s18 }
  0x12   :  { %4137 = sst [smem:[#allocation56_spill]] %s4107_s19 }
  0x13   :  { %4138 = sst [smem:[#allocation57_spill]] %s4108_s20 }
  0x14   :  { %4139 = sst [smem:[#allocation58_spill]] %s4109_s21 }
  0x15   :  { %4140 = sst [smem:[#allocation59_spill]] %s4110_s22 }
  0x16   :  { %28 = vsyncpa [#allocation3], 0 }
  0x17   :  { %30 = vsyncpa [#allocation3 + $0x1], 0 }
  0x18   :  { %31 = vsyncpa [#allocation6], 0 }
  0x19   :  { %32 = vsyncpa [#allocation9], 0 }
  0x1a   :  { %33 = vsyncpa [#allocation12], 0 }
  0x1b   :  { %34 = vsyncpa [#allocation15], 0 }
  0x1c   :  { %35 = vsyncpa [#allocation18], 0 }
  0x1d   :  { %36 = vsyncpa [#allocation21], 0 }
  0x1e   :  { %37 = vsyncpa [#allocation24], 0 }
  0x1f   :  { %38 = vsyncpa [#allocation4], 0 }
  0x20   :  { %40 = vsyncpa [#allocation4 + $0x1], 0 }
  0x21   :  { %41 = vsyncpa [#allocation27], 0 }
  0x22   :  { %43 = vsyncpa [#allocation27 + $0x1], 0  ;;  %s3552_s3 = smov 0   ;;  %s3554_s28 = smov 0  }
  0x23   :  { %s3556_s29 = smov 0   ;;  %s3558_s30 = smov 0  }
  0x24 LB: > { %s4141_s23 = sld [smem:[#allocation43_spill]]  ;;  %s3576_s5 = sadd.s32 4294967295, %s3412_s30   ;;  %s3412_s30 = sphi %s3558_s30, %s4175_s30   ;;  %s3408_s29 = sphi %s3556_s29, %s4174_s29   ;;  %s3404_s28 = sphi %s3554_s28, %s4173_s28   ;;  %s3400_s3 = sphi %s3552_s3, %s4172_s3  }
  0x25   : > { %p2413_p0 = scmp.ge.s32.totalorder %s3412_s30, 1  ;;  %p148_p1 = scmp.eq.s32.totalorder %s3576_s5, 0 }
  0x26   : > { %p572_p2 = scmp.lt.s32.totalorder %s3412_s30, 3  ;;  %s3414_s6 = smov [#allocation5]  }
  0x27   : > { %s585_s25 = sshll.u32 %s3414_s6, 4  ;;  %s4143_s27 = sld [smem:[#allocation45_spill]]  ;;  %s586_s25 = int_to_ptr.vmem [resolvable:$true] %s585_s25 }
  0x28   : > { %p3581_p3 = pnand %p2413_p0, %p572_p2  ;;  %s4145_s8 = sld [smem:[#allocation47_spill]] }
  0x29   : > { %s3415_s20 = smov [#allocation8]   ;;  %s3416_s22 = smov 64  }
  0x2a   : > { %s583_s1 = sshll.u32 %s4141_s23, 4  ;;  %p2655_p4 = pneg %p3581_p3  ;;  %s584_s1 = int_to_ptr.hbm [resolvable:$true] %s583_s1 }
  0x2b   : > { %s613_s18 = sshll.u32 %s3415_s20, 4  ;;  %s3417_s21 = smov 4   ;;  %s614_s18 = int_to_ptr.vmem [resolvable:$true] %s613_s18 }
  0x2c   : > { %p3593_p6 = pnand %p2655_p4, %p148_p1  ;;  %s4146_s10 = sld [smem:[#allocation49_spill]] }
  0x2d   : > { %s611_s4 = sshll.u32 %s4143_s27, 4  ;;  %s3418_s20 = smov [#allocation11]   ;;  %s612_s4 = int_to_ptr.hbm [resolvable:$true] %s611_s4 }
  0x2e   : > { %s640_s6 = sshll.u32 %s4145_s8, 4  ;;  %s642_s27 = sshll.u32 %s3418_s20, 4  ;;  %s641_s6 = int_to_ptr.hbm [resolvable:$true] %s640_s6  ;;  %s643_s27 = int_to_ptr.vmem [resolvable:$true] %s642_s27 }
  0x2f   : > { %2658 = dma.hbm_to_vmem [thread:$0]  (!%p3593_p6), %s584_s1, 256, %s586_s25, [#allocation6], %s3416_s22, %s3416_s22, %s3417_s21  }
  0x30   : > { %2664 = dma.hbm_to_vmem [thread:$0]  (!%p3593_p6), %s612_s4, 256, %s614_s18, [#allocation9], %s3416_s22, %s3416_s22, %s3417_s21  }
  0x31   : > { %2670 = dma.hbm_to_vmem [thread:$0]  (!%p3593_p6), %s641_s6, 16, %s643_s27, [#allocation12]  }
  0x32   : > { %s663_s2 = sshll.u32 %s4146_s10, 4  ;;  %s3419_s23 = smov [#allocation14]   ;;  %s664_s2 = int_to_ptr.hbm [resolvable:$true] %s663_s2 }
  0x33   : > { %s665_s1 = sshll.u32 %s3419_s23, 4  ;;  %s4147_s12 = sld [smem:[#allocation51_spill]]  ;;  %s666_s1 = int_to_ptr.vmem [resolvable:$true] %s665_s1 }
  0x34   : > { %2676 = dma.hbm_to_vmem [thread:$0]  (!%p3593_p6), %s664_s2, 256, %s666_s1, [#allocation15], %s3416_s22, %s3416_s22, %s3417_s21  }
  0x35   : > { %s4148_s14 = sld [smem:[#allocation53_spill]]  ;;  %s3420_s19 = smov [#allocation17]  }
  0x36   : > { %s693_s6 = sshll.u32 %s3420_s19, 4  ;;  %s3421_s8 = smov [#allocation20]   ;;  %s694_s6 = int_to_ptr.vmem [resolvable:$true] %s693_s6 }
  0x37   : > { %s722_s20 = sshll.u32 %s3421_s8, 4  ;;  %s4149_s25 = sld [smem:[#allocation44_spill]]  ;;  %s723_s20 = int_to_ptr.vmem [resolvable:$true] %s722_s20 }
  0x38   : > { %s4150_s7 = sld [smem:[#allocation46_spill]]  ;;  %s3422_s19 = smov [#allocation7]  }
  0x39   : > { %s691_s17 = sshll.u32 %s4147_s12, 4  ;;  %s599_s10 = sshll.u32 %s3422_s19, 4  ;;  %s692_s17 = int_to_ptr.hbm [resolvable:$true] %s691_s17  ;;  %s600_s10 = int_to_ptr.vmem [resolvable:$true] %s599_s10 }
  0x3a   : > { %2682 = dma.hbm_to_vmem [thread:$0]  (!%p3593_p6), %s692_s17, 256, %s694_s6, [#allocation18], %s3416_s22, %s3416_s22, %s3417_s21  }
  0x3b   : > { %s720_s26 = sshll.u32 %s4148_s14, 4  ;;  %s3423_s17 = smov [#allocation10]   ;;  %s721_s26 = int_to_ptr.hbm [resolvable:$true] %s720_s26 }
  0x3c   : > { %2688 = dma.hbm_to_vmem [thread:$0]  (!%p3593_p6), %s721_s26, 16, %s723_s20, [#allocation21]  }
  0x3d   : > { %s597_s2 = sshll.u32 %s4149_s25, 4  ;;  %s627_s6 = sshll.u32 %s3423_s17, 4  ;;  %s598_s2 = int_to_ptr.hbm [resolvable:$true] %s597_s2  ;;  %s628_s6 = int_to_ptr.vmem [resolvable:$true] %s627_s6 }
  0x3e   : > { %s625_s4 = sshll.u32 %s4150_s7, 4  ;;  %s4151_s9 = sld [smem:[#allocation48_spill]]  ;;  %s626_s4 = int_to_ptr.hbm [resolvable:$true] %s625_s4 }
  0x3f   : > { %2661 = dma.hbm_to_vmem [thread:$0]  (!%p3593_p6), %s598_s2, 256, %s600_s10, [#allocation6], %s3416_s22, %s3416_s22, %s3417_s21  }
  0x40   : > { %2667 = dma.hbm_to_vmem [thread:$0]  (!%p3593_p6), %s626_s4, 256, %s628_s6, [#allocation9], %s3416_s22, %s3416_s22, %s3417_s21  }
  0x41   : > { %s4152_s11 = sld [smem:[#allocation50_spill]]  ;;  %s3424_s1 = smov [#allocation13]  }
  0x42   : > { %s654_s10 = sshll.u32 %s3424_s1, 4  ;;  %s3425_s2 = smov [#allocation16]   ;;  %s655_s10 = int_to_ptr.vmem [resolvable:$true] %s654_s10 }
  0x43   : > { %s679_s18 = sshll.u32 %s3425_s2, 4  ;;  %s4153_s13 = sld [smem:[#allocation52_spill]]  ;;  %s680_s18 = int_to_ptr.vmem [resolvable:$true] %s679_s18 }
  0x44   : > { %s652_s26 = sshll.u32 %s4151_s9, 4  ;;  %s732_s27 = sshll.u32 %s4103_s15, 4  ;;  %s653_s26 = int_to_ptr.hbm [resolvable:$true] %s652_s26  ;;  %s733_s27 = int_to_ptr.hbm [resolvable:$true] %s732_s27 }
  0x45   : > { %2673 = dma.hbm_to_vmem [thread:$0]  (!%p3593_p6), %s653_s26, 16, %s655_s10, [#allocation12]  }
  0x46   : > { %s3426_s26 = smov [#allocation19]   ;;  %s3427_s23 = smov [#allocation22]  }
  0x47   : > { %s677_s25 = sshll.u32 %s4152_s11, 4  ;;  %s707_s20 = sshll.u32 %s3426_s26, 4  ;;  %s678_s25 = int_to_ptr.hbm [resolvable:$true] %s677_s25  ;;  %s708_s20 = int_to_ptr.vmem [resolvable:$true] %s707_s20 }
  0x48   : > { %2679 = dma.hbm_to_vmem [thread:$0]  (!%p3593_p6), %s678_s25, 256, %s680_s18, [#allocation15], %s3416_s22, %s3416_s22, %s3417_s21  }
  0x49   : > { %s705_s8 = sshll.u32 %s4153_s13, 4  ;;  %s734_s25 = sshll.u32 %s3427_s23, 4  ;;  %s706_s8 = int_to_ptr.hbm [resolvable:$true] %s705_s8  ;;  %s735_s25 = int_to_ptr.vmem [resolvable:$true] %s734_s25 }
  0x4a   : > { %2685 = dma.hbm_to_vmem [thread:$0]  (!%p3593_p6), %s706_s8, 256, %s708_s20, [#allocation18], %s3416_s22, %s3416_s22, %s3417_s21  }
  0x4b   : > { %s743_s2 = sshll.u32 %s4104_s16, 4  ;;  %s3428_s18 = smov [#allocation23]   ;;  %s744_s2 = int_to_ptr.hbm [resolvable:$true] %s743_s2 }
  0x4c   : > { %2691 = dma.hbm_to_vmem [thread:$0]  (!%p3593_p6), %s733_s27, 16, %s735_s25, [#allocation21]  }
  0x4d   : > { %s745_s19 = sshll.u32 %s3428_s18, 4  ;;  %s4116_s17 = sadd.s32 4294967294, %s3412_s30   ;;  %s746_s19 = int_to_ptr.vmem [resolvable:$true] %s745_s19 }
  0x4e   : > { %2694 = dma.hbm_to_vmem [thread:$0]  (!%p3593_p6), %s744_s2, 256, %s746_s19, [#allocation24], %s3416_s22, %s3416_s22, %s3417_s21  }
  0x4f   : > { %s3685_s8 = sadd.s32 1, %s3412_s30   ;;  %s134_s4 = sadd.s32 1, %s3408_s29 }
  0x50   : > { %s131_s6 = ssub.s32 %s3412_s30, %s3685_s8  ;;  %p141_p7 = scmp.ne.s32.totalorder %s3408_s29, %s3404_s28 }
  0x51   : > { %p132_p8 = scmp.eq.s32.totalorder %s131_s6, 0  ;;  %p142_p9 = scmp.eq.s32.totalorder %s3412_s30, 0 }
  0x52   : > { %p147_p10 = scmp.ne.s32.totalorder %s3404_s28, %s3400_s3  ;;  %p507_p11 = scmp.eq.s32.totalorder %s3576_s5, 1 }
  0x53   : > { %s3697_s27 = scalar_select %p132_p8, %s3408_s29, %s134_s4  }
  0x54   : > { %p3701_p12 = por %p148_p1, %p147_p10  ;;  %p3705_p13 = por %p507_p11, %p141_p7 }
  0x55   : > { %p513_p0 = scmp.eq.s32.totalorder %s4116_s17, 1  ;;  %p143_p2 = por %p142_p9, %p141_p7 }
  0x56   : > { %s789_s22 = sand.u32 1, %s3408_s29   ;;  %p2722_p6 = scmp.lt.s32.totalorder %s3412_s30, 2 }
  0x57   : > { %p3712_p4 = por %p513_p0, %p147_p10  ;;  %s2428_s20 = sshll.u32 %s789_s22, 3 }
  0x58   : > { %s2429_s23 = sshll.u32 %s3412_s30, 3  ;;  %s4157_s10 = sld [smem:[#allocation42_spill]] }
  0x59   : > { %s793_s19 = scalar_lea.vmem [#allocation2], %s2428_s20  ;;  %p3721_p8 = pnand %p2722_p6, %p143_p2 }
  0x5a   : > { %s801_s4 = sshll.u32 %s793_s19, 4  ;;  %s790_s17 = scalar_lea.sflag [#allocation3], %s789_s22  ;;  %s802_s4 = int_to_ptr.vmem [resolvable:$true] %s801_s4 }
  0x5b   : > { %p3232_p9 = pneg %p3721_p8 }
  0x5e   : > { %s797_s2 = scalar_lea.hbm %s4157_s10, %s2429_s23  ;;  %s3235_s20 = scalar_lea.hbm %s4157_s10, 16 }
  0x5f   : > { %s799_s18 = sshll.u32 %s797_s2, 4  ;;  %s800_s18 = int_to_ptr.hbm [resolvable:$true] %s799_s18 }
  0x60   : > { %s3228_s7 = sshra.s32 %s800_s18, 4  ;;  %s3229_s7 = int_to_ptr.hbm [resolvable:$true] %s3228_s7 }
  0x61   : > { %s3230_s9 = scalar_lea.hbm %s3229_s7, 8  ;;  %p3236_p0 = scmp.lt.s32.totalorder %s3229_s7, %s4157_s10 }
  0x62   : > { %p3231_p7 = scmp.ne.s32.totalorder %s3229_s7, %s3230_s9  ;;  %p3237_p2 = scmp.lt.s32.totalorder %s3235_s20, %s3230_s9 }
  0x64   : > { %p3233_p10 = pnand %p3232_p9, %p3231_p7  ;;  %p3238_p6 = por %p3237_p2, %p3236_p0 }
  0x66   : > { %p3234_p11 = pneg %p3233_p10 }
  0x68   : > { %p3239_p5 = pnand %p3238_p6, %p3234_p11 }
  0x6a   : > { %3242 = shalt.err (!%p3239_p5)
}
  0x6b   : > { %2698 = dma.hbm_to_vmem [thread:$0]  (!%p3721_p8), %s800_s18, 128, %s802_s4, %s790_s17  }
  0x6c   : > { %810 = sbr.rel (%p3581_p3) target bundleno = 2947 (0xb83), region = 100  ;;  %s3738_s22 = sand.u32 (!%p3581_p3), 1, %s3404_s28  }
  0x6d   : > { %s3741_s19 = sshll.u32 (!%p3581_p3), %s3738_s22, 3  ;;  %s813_s7 = scalar_lea.sflag (!%p3581_p3), [#allocation3], %s3738_s22 }
  0x6e   : > { %s816_s9 = scalar_lea.vmem (!%p3581_p3), [#allocation2], %s3741_s19 }
  0x71   : > { %3359 = dma.done.wait (%p3701_p12), %s813_s7, 128  }
  0x72   : > { %3361 = vsyncadd (%p3701_p12), %s813_s7, 4294967168 }
  0x73   : > { %3363 = dma.done.wait (%p148_p1), [#allocation6], 512  }
  0x74   : > { %3365 = vsyncadd (%p148_p1), [#allocation6], 4294966784 }
  0x75   : > { %3367 = dma.done.wait (%p148_p1), [#allocation9], 512  }
  0x76   : > { %3369 = vsyncadd (%p148_p1), [#allocation9], 4294966784 }
  0x77   : > { %3371 = dma.done.wait (%p148_p1), [#allocation12], 32  }
  0x78   : > { %3373 = vsyncadd (%p148_p1), [#allocation12], 4294967264 }
  0x79   : > { %3375 = dma.done.wait (%p148_p1), [#allocation15], 512  }
  0x7a   : > { %3377 = vsyncadd (%p148_p1), [#allocation15], 4294966784 }
  0x7b   : > { %3379 = dma.done.wait (%p148_p1), [#allocation18], 512  }
  0x7c   : > { %3381 = vsyncadd (%p148_p1), [#allocation18], 4294966784 }
  0x7d   : > { %3383 = dma.done.wait (%p148_p1), [#allocation21], 32  }
  0x7e   : > { %3385 = vsyncadd (%p148_p1), [#allocation21], 4294967264 }
  0x7f   : > { %3387 = dma.done.wait (%p148_p1), [#allocation24], 256  }
  0x80   : > { %3389 = vsyncadd (%p148_p1), [#allocation24], 4294967040  ;;  %p965_p3 = scmp.lt.s32.totalorder %s3576_s5, 1  ;;  %s4159_s4 = sld [smem:[#allocation39_spill]]  ;;  %v2574_v0 = vld [vmem:[#allocation5 + $0x8] sm:$0xff]  ;;  %v2576_v1 = vld [vmem:[#allocation7 + $0x8] sm:$0xff] }
  0x81   : > { %v2573_v2 = vld [vmem:[#allocation5] sm:$0xff]  ;;  %v2575_v3 = vld [vmem:[#allocation7] sm:$0xff]  ;;  %1008 = vmatpush.bf16.msra.mxu0 %v2574_v0  ;;  %1038 = vmatpush.bf16.msra.mxu1 %v2576_v1  ;;  %vm998_vm0 = vcmask 261120   ;;  %vm1079_vm1 = vcmask 64512   ;;  %s3429_s23 = smov 112   ;;  %s3430_s25 = smov 120  }
  0x82   : > { %s966_s24 = scalar_select %p965_p3, %s3576_s5, 1  ;;  %v3432_v27 = vmov 0.0   ;;  %v2578_v34 = vld [vmem:[#allocation8 + $0x8] sm:$0xff]  ;;  %v2577_v35 = vld [vmem:[#allocation8] sm:$0xff]  ;;  %vm1127_vm3 = vcmask 1043456  }
  0x83   : > { %s3431_s20 = smov 104   ;;  %s4160_s7 = sld [smem:[#allocation41_spill]]  ;;  %1067 = vmatpush.bf16.msra.mxu2 %v2578_v34 }
  0x84   : > { %s3779_s17 = sshll.u32 %s966_s24, 3  ;;  %s4117_s0 = smov 8  }
  0x85   : > { %1009 = vmatpush.bf16.msra.mxu0 %v2573_v2  ;;  %1039 = vmatpush.bf16.msra.mxu1 %v2575_v3  ;;  %s4118_s18 = smov 24   ;;  %s4161_s2 = sld [smem:[#allocation40_spill]] }
  0x86   : > { %s968_s6 = scalar_lea.vmem %s4159_s4, %s3779_s17  ;;  %s3435_s4 = smov 16  }
  0x87   : > { %v3785_v4 = vld [vmem:[%s968_s6] sm:$0xff]  ;;  %1068 = vmatpush.bf16.msra.mxu2 %v2577_v35  ;;  %s957_s6 = scalar_lea.vmem [#allocation26], %s3741_s19 }
  0x88   : > { %v981_v5 = vpack.c.bf16 %v3785_v4, %v3785_v4 }
  0x89   : > { %s976_s24 = scalar_lea.vmem %s4160_s7, %s3779_s17 }
  0x8a   : > { %2459 = vmatmul.msk.bf16.vlgmr.msra.gmra.mxu0 %vm998_vm0, %v981_v5  ;;  %2468 = vmatmul.msk.bf16.vlgmr.msra.gmra.mxu1 %vm998_vm0, %v981_v5  ;;  %v980_v26 = vld [vmem:[%s976_s24] sm:$0xff] }
  0x8b   : > { %vm1077_vm2 = vcmp.ne.s32.totalorder %v980_v26, 0  ;;  %2477 = vmatmul.msk.bf16.vlgmr.msra.gmra.mxu2 %vm998_vm0, %v981_v5  ;;  %s972_s7 = scalar_lea.vmem %s4161_s2, %s3779_s17 }
  0x8c   : > { %v1078_v28 = vsel %vm1077_vm2, -1e+09, %v3432_v27 }
 0x107   : > { %v1011_v6 = vpop.f32.mrf.mxu0  ;;  %v1041_v7 = vpop.f32.mrf.mxu1 }
 0x108   : > { %v1015_v8 = vmul.f32 0.35355338, %v1011_v6  ;;  %v1075_v9 = vpack.c.bf16 %v1041_v7, %v1041_v7 }
 0x10a   : > { %v1074_v10 = vpack.c.bf16 %v1015_v8, %v1015_v8  ;;  %v1150_v11 = vunpack.c.l.b16 %v1075_v9  ;;  %v1084_v12 = vsel %vm1079_vm1, %v1075_v9, 0 }
 0x10b   : > { %1093 = vmatpush.bf16.xpose.msra.mxu3 %v1084_v12 }
 0x10c   : > { %v1145_v13 = vunpack.c.l.b16 %v1074_v10  ;;  %v1151_v14 = vpack.c.b16 %v1150_v11, %v1150_v11 }
 0x10e   : > { %v1146_v15 = vpack.c.b16 %v1145_v13, %v1145_v13  ;;  %1224 = vrot.lane.b32.xlu1 %v1151_v14, %s3429_s23  ;;  %1152 = vrot.lane.b32.xlu0 %v1151_v14, %s3430_s25  ;;  %v1070_v53 = vpop.f32.mrf.mxu2 }
 0x10f   : > { %v1013_v16 = vpop.f32.mrf.mxu0  ;;  %v1043_v17 = vpop.f32.mrf.mxu1  ;;  %v1076_v54 = vpack.c.bf16 %v1070_v53, %v1070_v53 }
 0x110   : > { %1222 = vrot.lane.b32.xlu2 %v1146_v15, %s3429_s23 }
 0x111   : > { %v1129_v57 = vsel %vm1127_vm3, %v1076_v54, 0  ;;  %v1199_v8 = vunpack.c.l.b16 %v1076_v54 }
 0x112   : > { %2478 = vmatmul.msk.bf16.vlgmr.msra.gmra.mxu3 %vm1079_vm1, %v1074_v10  ;;  %1138 = vmatpush.bf16.msrb.mxu0 %v1129_v57 }
 0x113   : > { %v1200_v16 = vpack.c.b16 %v1199_v8, %v1199_v8 }
 0x116   : > { %1293 = vrot.lane.b32.xlu1 %v1151_v14, %s3431_s20  ;;  %1147 = vrot.lane.b32.xlu0 %v1146_v15, %s3430_s25  ;;  %v1072_v58 = vpop.f32.mrf.mxu2 }
 0x118   : > { %1291 = vrot.lane.b32.xlu2 %v1146_v15, %s3431_s20 }
 0x16a   : > { %v1223_v22 = vpop.permute.xlu2 %1222 }
 0x172   : > { %v1292_v31 = vpop.permute.xlu2 %1291 }
 0x180   : > { %v1225_v18 = vpop.permute.xlu1 %1224  ;;  %v1153_v19 = vpop.permute.xlu0 %1152 }
 0x181   : > { %v1158_v20 = vsel %vm1079_vm1, %v1153_v19, 0  ;;  %v1230_v21 = vsel %vm1079_vm1, %v1225_v18, 0 }
 0x182   : > { %1167 = vmatpush.bf16.xpose.msrb.mxu1 %v1158_v20  ;;  %1239 = vmatpush.bf16.xpose.msrb.mxu3 %v1230_v21 }
 0x188   : > { %v1294_v23 = vpop.permute.xlu1 %1293  ;;  %v1148_v24 = vpop.permute.xlu0 %1147 }
 0x189   : > { %v1299_v25 = vsel %vm1079_vm1, %v1294_v23, 0  ;;  %2480 = vmatmul.msk.bf16.vlgmr.msrb.gmra.mxu1 %vm1079_vm1, %v1148_v24  ;;  %2482 = vmatmul.msk.bf16.vlgmr.msrb.gmra.mxu3 %vm1079_vm1, %v1223_v22 }
 0x18a   : > { %1308 = vmatpush.bf16.xpose.msra.mxu1 %v1299_v25 }
 0x195   : > { %v1095_v29 = vpop.f32.mrf.mxu3 }
 0x196   : > { %v1096_v30 = vadd.f32 %v1095_v29, %v1078_v28 }
 0x198   : > { %v1099_v32 = vsel %vm1079_vm1, %v1096_v30, -inf }
 0x199   : > { %2484 = vmatmul.msk.bf16.vlgmr.msra.gmra.mxu1 %vm1079_vm1, %v1292_v31  ;;  %1100 = vmax.xlane.f32.xlu1 %v1099_v32 }
 0x19d   : > { %v1097_v33 = vpop.f32.mrf.mxu3 }
 0x206   : > { %v1169_v36 = vpop.f32.mrf.mxu1 }
 0x207   : > { %v1170_v37 = vadd.f32 %v1169_v36, %v1078_v28 }
 0x209   : > { %v1173_v38 = vsel %vm1079_vm1, %v1170_v37, -inf }
 0x20a   : > { %1174 = vmax.xlane.f32.xlu0 %v1173_v38 }
 0x20c   : > { %v1241_v39 = vpop.f32.mrf.mxu3  ;;  %v1101_v40 = vpop.xlane.xlu1 %1100 }
 0x20d   : > { %v1102_v41 = vsub.f32 %v1096_v30, %v1101_v40  ;;  %v1242_v50 = vadd.f32 %v1241_v39, %v1078_v28 }
 0x20e   : > { %v1171_v42 = vpop.f32.mrf.mxu1 }
 0x20f   : > { %v1103_v43 = vmul.f32 1.442695, %v1102_v41  ;;  %v1245_v52 = vsel %vm1079_vm1, %v1242_v50, -inf }
 0x211   : > { %2798 = vpow2.f32 %v1103_v43 }
 0x214   : > { %v1243_v44 = vpop.f32.mrf.mxu3 }
 0x216   : > { %v1310_v45 = vpop.f32.mrf.mxu1 }
 0x217   : > { %v2799_v46 = vpop.eup %2798  ;;  %v1311_v47 = vadd.f32 %v1310_v45, %v1078_v28 }
 0x218   : > { %v1105_v48 = vsel %vm1079_vm1, %v2799_v46, 0.0 }
 0x219   : > { %1106 = vadd.xlane.f32.xlu1 %v1105_v48  ;;  %v1314_v49 = vsel %vm1079_vm1, %v1311_v47, -inf }
 0x21a   : > { %1315 = vmax.xlane.f32.xlu2 %v1314_v49 }
 0x21e   : > { %v1312_v51 = vpop.f32.mrf.mxu1 }
 0x222   : > { %1246 = vmax.xlane.f32.xlu2 %v1245_v52 }
 0x27d   : > { %v1175_v55 = vpop.xlane.xlu0 %1174 }
 0x27e   : > { %v1176_v56 = vsub.f32 %v1170_v37, %v1175_v55 }
 0x280   : > { %v1177_v59 = vmul.f32 1.442695, %v1176_v56 }
 0x282   : > { %2800 = vpow2.f32 %v1177_v59 }
 0x288   : > { %v2801_v60 = vpop.eup %2800 }
 0x289   : > { %v1179_v61 = vsel %vm1079_vm1, %v2801_v60, 0.0 }
 0x28a   : > { %1180 = vadd.xlane.f32.xlu0 %v1179_v61 }
 0x28c   : > { %v1107_v62 = vpop.xlane.xlu1 %1106 }
 0x28d   : > { %2802 = vrcp.f32 %v1107_v62  ;;  %v1316_v63 = vpop.xlane.xlu2 %1315  ;;  %v1119_v9 = vand.u32 2147483648, %v1107_v62  ;;  %v1117_v12 = vand.u32 2147483647, %v1107_v62  ;;  %vm1113_vm5 = vweird.f32 %v1107_v62 }
 0x28e   : > { %v1317_v0 = vsub.f32 %v1311_v47, %v1316_v63 }
 0x28f   : > { %v1120_v17 = vor.u32 1.1754944e-38, %v1119_v9  ;;  %vm1118_vm7 = vcmp.eq.f32.partialorder %v1117_v12, 8.507059e+37 }
 0x290   : > { %v1318_v1 = vmul.f32 1.442695, %v1317_v0 }
 0x292   : > { %2804 = vpow2.f32 %v1318_v1 }
 0x293   : > { %v2803_v2 = vpop.eup %2802 }
 0x294   : > { %v1109_v3 = vmul.f32 %v2803_v2, %v1107_v62  ;;  %vm1114_vm4 = vweird.f32 %v2803_v2 }
 0x295   : > { %v1247_v5 = vpop.xlane.xlu2 %1246  ;;  %vm1115_vm6 = vmor %vm1113_vm5, %vm1114_vm4 }
 0x296   : > { %v1110_v6 = vsub.f32 1.0, %v1109_v3  ;;  %v1248_v7 = vsub.f32 %v1242_v50, %v1247_v5 }
 0x298   : > { %v3818_v10 = vpop.eup %2804  ;;  %v1111_v11 = vmul.f32 %v2803_v2, %v1110_v6  ;;  %v1249_v13 = vmul.f32 1.442695, %v1248_v7 }
 0x299   : > { %v1320_v14 = vsel %vm1079_vm1, %v3818_v10, 0.0 }
 0x29a   : > { %v1112_v15 = vadd.f32 %v2803_v2, %v1111_v11  ;;  %2806 = vpow2.f32 %v1249_v13  ;;  %1321 = vadd.xlane.f32.xlu2 %v1320_v14 }
 0x29c   : > { %v1116_v18 = vsel %vm1115_vm6, %v2803_v2, %v1112_v15  ;;  %v2580_v15 = vld [vmem:[#allocation10 + $0x8] sm:$0xff] }
 0x29d   : > { %v1121_v19 = vsel %vm1118_vm7, %v1120_v17, %v1116_v18  ;;  %1419 = vmatpush.bf16.msra.mxu3 %v2580_v15  ;;  %vm1373_vm7 = vcmask 130048  }
 0x29e   : > { %1201 = vrot.lane.b32.xlu0 %v1200_v16, %s3430_s25  ;;  %v3823_v20 = vmul.f32 %v2799_v46, %v1121_v19 }
 0x2a0   : > { %v3825_v21 = vpop.eup %2806  ;;  %v1123_v22 = vpack.c.bf16 %v3823_v20, %v3823_v20 }
 0x2a1   : > { %v1251_v23 = vsel %vm1079_vm1, %v3825_v21, 0.0 }
 0x2a2   : > { %1252 = vadd.xlane.f32.xlu1 %v1251_v23  ;;  %2479 = vmatmul.msk.bf16.vlgmr.msrb.gmra.mxu0 %vm1079_vm1, %v1123_v22 }
 0x2b2   : > { %1339 = vrot.lane.b32.xlu2 %v1200_v16, %s3431_s20 }
 0x2bb   : > { %1270 = vrot.lane.b32.xlu1 %v1200_v16, %s3429_s23  ;;  %v2579_v16 = vld [vmem:[#allocation10] sm:$0xff] }
 0x2bc   : > { %1420 = vmatpush.bf16.msra.mxu3 %v2579_v16 }
 0x2fd   : > { %v1181_v24 = vpop.xlane.xlu0 %1180 }
 0x2fe   : > { %2808 = vrcp.f32 %v1181_v24  ;;  %v1193_v30 = vand.u32 2147483648, %v1181_v24  ;;  %v1191_v31 = vand.u32 2147483647, %v1181_v24  ;;  %vm1187_vm9 = vweird.f32 %v1181_v24 }
 0x300   : > { %v1194_v34 = vor.u32 1.1754944e-38, %v1193_v30  ;;  %vm1192_vm11 = vcmp.eq.f32.partialorder %v1191_v31, 8.507059e+37 }
 0x304   : > { %v2809_v25 = vpop.eup %2808 }
 0x305   : > { %v1183_v26 = vmul.f32 %v2809_v25, %v1181_v24  ;;  %vm1188_vm8 = vweird.f32 %v2809_v25 }
 0x306   : > { %vm1189_vm10 = vmor %vm1187_vm9, %vm1188_vm8  ;;  %vm1375_vm8 = vcmask 195584  }
 0x307   : > { %v1184_v28 = vsub.f32 1.0, %v1183_v26 }
 0x309   : > { %v1185_v29 = vmul.f32 %v2809_v25, %v1184_v28 }
 0x30b   : > { %v1186_v32 = vadd.f32 %v2809_v25, %v1185_v29 }
 0x30d   : > { %v1190_v33 = vsel %vm1189_vm10, %v2809_v25, %v1186_v32  ;;  %v1322_v35 = vpop.xlane.xlu2 %1321  ;;  %v3436_v32 = vmov 32.0  }
 0x30e   : > { %2810 = vrcp.f32 %v1322_v35  ;;  %v1195_v36 = vsel %vm1192_vm11, %v1194_v34, %v1190_v33  ;;  %v1334_v47 = vand.u32 2147483648, %v1322_v35  ;;  %v1332_v49 = vand.u32 2147483647, %v1322_v35  ;;  %v2584_v33 = vld [vmem:[#allocation16 + $0x8] sm:$0xff]  ;;  %v979_v34 = vld [vmem:[%s972_s7] sm:$0xff]  ;;  %s2070_s7 = sand.u32 1, %s3576_s5  }
 0x30f   : > { %v3834_v38 = vmul.f32 %v2801_v60, %v1195_v36  ;;  %vm1328_vm13 = vweird.f32 %v1322_v35  ;;  %1528 = vmatpush.bf16.msrb.mxu1 %v2584_v33  ;;  %v3868_v36 = vpack.c.bf16 %v979_v34, %v979_v34  ;;  %s3992_s2 = scalar_lea.sflag [#allocation27], %s2070_s7 }
 0x310   : > { %v1202_v37 = vpop.permute.xlu0 %1201  ;;  %v1335_v52 = vor.u32 1.1754944e-38, %v1334_v47  ;;  %vm1333_vm15 = vcmp.eq.f32.partialorder %v1332_v49, 8.507059e+37 }
 0x311   : > { %v1207_v39 = vsel %vm1127_vm3, %v1202_v37, 0  ;;  %v1197_v40 = vpack.c.bf16 %v3834_v38, %v3834_v38 }
 0x312   : > { %1216 = vmatpush.bf16.msrb.mxu2 %v1207_v39 }
 0x314   : > { %v2811_v41 = vpop.eup %2810 }
 0x315   : > { %v1324_v42 = vmul.f32 %v2811_v41, %v1322_v35  ;;  %2481 = vmatmul.msk.bf16.vlgmr.msrb.gmra.mxu2 %vm1079_vm1, %v1197_v40  ;;  %v1340_v43 = vpop.permute.xlu2 %1339  ;;  %v1253_v44 = vpop.xlane.xlu1 %1252  ;;  %vm1329_vm12 = vweird.f32 %v2811_v41  ;;  %v2583_v35 = vld [vmem:[#allocation16] sm:$0xff] }
 0x316   : > { %v1345_v45 = vsel %vm1127_vm3, %v1340_v43, 0  ;;  %2812 = vrcp.f32 %v1253_v44  ;;  %vm1330_vm14 = vmor %vm1328_vm13, %vm1329_vm12  ;;  %v1265_v61 = vand.u32 2147483648, %v1253_v44  ;;  %vm1259_vm4 = vweird.f32 %v1253_v44  ;;  %1529 = vmatpush.bf16.msrb.mxu1 %v2583_v35  ;;  %v2581_v43 = vld [vmem:[#allocation14] sm:$0xff] }
 0x317   : > { %v1325_v46 = vsub.f32 1.0, %v1324_v42  ;;  %1354 = vmatpush.bf16.msra.mxu2 %v1345_v45  ;;  %v1263_v63 = vand.u32 2147483647, %v1253_v44  ;;  %2814 = vrcp.f32 %v3436_v32  ;;  %v2582_v42 = vld [vmem:[#allocation14 + $0x8] sm:$0xff] }
 0x318   : > { %v1266_v1 = vor.u32 1.1754944e-38, %v1265_v61 }
 0x319   : > { %v1326_v48 = vmul.f32 %v2811_v41, %v1325_v46  ;;  %vm1264_vm6 = vcmp.eq.f32.partialorder %v1263_v63, 8.507059e+37  ;;  %2512 = vmatmul.msk.bf16.vlgmr.msrb.gmra.mxu1 %vm998_vm0, %v3868_v36  ;;  %v2793_v63 = vld [vmem:[#allocation13] ss:$0 sm:$0xff] }
 0x31b   : > { %v1327_v50 = vadd.f32 %v2811_v41, %v1326_v48 }
 0x31c   : > { %v2813_v51 = vpop.eup %2812 }
 0x31d   : > { %v1331_v53 = vsel %vm1330_vm14, %v2811_v41, %v1327_v50  ;;  %v1255_v54 = vmul.f32 %v2813_v51, %v1253_v44  ;;  %vm1260_vm2 = vweird.f32 %v2813_v51 }
 0x31e   : > { %v1336_v55 = vsel %vm1333_vm15, %v1335_v52, %v1331_v53  ;;  %vm1261_vm5 = vmor %vm1259_vm4, %vm1260_vm2 }
 0x31f   : > { %v3842_v56 = vmul.f32 %v3818_v10, %v1336_v55  ;;  %v1256_v57 = vsub.f32 1.0, %v1255_v54  ;;  %v1140_v58 = vpop.f32.mrf.mxu0 }
 0x321   : > { %v1257_v59 = vmul.f32 %v2813_v51, %v1256_v57  ;;  %v1338_v62 = vpack.c.bf16 %v3842_v56, %v3842_v56 }
 0x323   : > { %v1258_v60 = vadd.f32 %v2813_v51, %v1257_v59 }
 0x325   : > { %2485 = vmatmul.msk.bf16.vlgmr.msra.gmra.mxu2 %vm1079_vm1, %v1338_v62  ;;  %v1262_v0 = vsel %vm1261_vm5, %v2813_v51, %v1258_v60  ;;  %v2792_v60 = vld [vmem:[#allocation11] ss:$0 sm:$0xff] }
 0x326   : > { %v1267_v3 = vsel %vm1264_vm6, %v1266_v1, %v1262_v0 }
 0x327   : > { %v1142_v2 = vpop.f32.mrf.mxu0  ;;  %v3848_v5 = vmul.f32 %v3825_v21, %v1267_v3 }
 0x329   : > { %v1269_v8 = vpack.c.bf16 %v3848_v5, %v3848_v5 }
 0x32d   : > { %v1271_v6 = vpop.permute.xlu1 %1270 }
 0x32e   : > { %v1276_v7 = vsel %vm1127_vm3, %v1271_v6, 0 }
 0x32f   : > { %1285 = vmatpush.bf16.msra.mxu0 %v1276_v7 }
 0x332   : > { %2483 = vmatmul.msk.bf16.vlgmr.msra.gmra.mxu0 %vm1079_vm1, %v1269_v8 }
 0x333   : > { %1495 = vmatpush.bf16.msrb.mxu0 %v2582_v42 }
 0x337   : > { %1496 = vmatpush.bf16.msrb.mxu0 %v2581_v43 }
 0x396   : > { %v1531_v3 = vpop.f32.mrf.mxu1 }
 0x397   : > { %v1565_v6 = vpack.c.bf16 %v1531_v3, %v1531_v3 }
 0x398   : > { %v1218_v9 = vpop.f32.mrf.mxu2 }
 0x399   : > { %1379 = vrot.lane.b32.xlu0 %v1218_v9, %s4117_s0  ;;  %v1573_v7 = vsel %vm1079_vm1, %v1565_v6, 0  ;;  %v1638_v8 = vunpack.c.l.b16 %v1565_v6 }
 0x39a   : > { %1582 = vmatpush.bf16.xpose.msrb.mxu3 %v1573_v7 }
 0x39b   : > { %v1639_v9 = vpack.c.b16 %v1638_v8, %v1638_v8 }
 0x3a0   : > { %v1220_v10 = vpop.f32.mrf.mxu2 }
 0x3a1   : > { %v1533_v10 = vpop.f32.mrf.mxu1 }
 0x3a8   : > { %v1356_v11 = vpop.f32.mrf.mxu2 }
 0x3a9   : > { %1387 = vrot.lane.b32.xlu2 %v1356_v11, %s4118_s18 }
 0x3af   : > { %v1287_v12 = vpop.f32.mrf.mxu0 }
 0x3b0   : > { %v1358_v13 = vpop.f32.mrf.mxu2  ;;  %1383 = vrot.lane.b32.xlu0 %v1287_v12, %s3435_s4 }
 0x3b1   : > { %1640 = vrot.lane.b32.xlu2 %v1639_v9, %s3430_s25 }
 0x3b7   : > { %v1289_v14 = vpop.f32.mrf.mxu0 }
 0x3b9   : > { %1712 = vrot.lane.b32.xlu2 %v1639_v9, %s3429_s23 }
 0x403   : > { %v1388_v21 = vpop.permute.xlu2 %1387 }
 0x40b   : > { %v1380_v17 = vpop.permute.xlu0 %1379 }
 0x40c   : > { %v1390_v18 = vsel %vm1079_vm1, %v1140_v58, %v1380_v17  ;;  %v1641_v17 = vpop.permute.xlu2 %1640 }
 0x422   : > { %v1384_v19 = vpop.permute.xlu0 %1383 }
 0x423   : > { %v1391_v22 = vsel %vm1373_vm7, %v1390_v18, %v1384_v19  ;;  %v1646_v18 = vsel %vm1079_vm1, %v1641_v17, 0  ;;  %v1713_v19 = vpop.permute.xlu2 %1712 }
 0x424   : > { %v1392_v23 = vsel %vm1375_vm8, %v1391_v22, %v1388_v21  ;;  %1655 = vmatpush.bf16.xpose.msra.mxu1 %v1646_v18  ;;  %v1718_v21 = vsel %vm1079_vm1, %v1713_v19, 0 }
 0x425   : > { %v1393_v24 = vpack.c.bf16 %v1392_v23, %v1392_v23 }
 0x427   : > { %2494 = vmatmul.msk.bf16.vlgmr.msra.gmra.mxu3 %vm998_vm0, %v1393_v24 }
 0x428   : > { %1727 = vmatpush.bf16.xpose.msra.mxu3 %v1718_v21 }
 0x4aa   : > { %v1422_v25 = vpop.f32.mrf.mxu3 }
 0x4ab   : > { %v1423_v26 = vadd.f32 %v1422_v25, %v3785_v4  ;;  %v2815_v4 = vpop.eup %2814  ;;  %v2586_v25 = vld [vmem:[#allocation17 + $0x8] sm:$0xff] }
 0x4ac   : > { %v1432_v37 = vmul.f32 32.0, %v2815_v4  ;;  %vm1436_vm9 = vweird.f32 %v2815_v4  ;;  %1557 = vmatpush.bf16.msrb.mxu2 %v2586_v25 }
 0x4ad   : > { %v1428_v28 = vsel %vm998_vm0, %v1423_v26, 0.0  ;;  %v1439_v29 = vmul.f32 %v1423_v26, %v1423_v26 }
 0x4ae   : > { %1429 = vadd.xlane.f32.xlu1 %v1428_v28  ;;  %v1433_v39 = vsub.f32 1.0, %v1432_v37 }
 0x4af   : > { %v1440_v30 = vsel %vm998_vm0, %v1439_v29, 0.0 }
 0x4b0   : > { %1441 = vadd.xlane.f32.xlu0 %v1440_v30  ;;  %v1434_v40 = vmul.f32 %v2815_v4, %v1433_v39  ;;  %v1467_v30 = vld [vmem:[%s816_s9] sm:$0xff]  ;;  %s3986_s9 = sshll.u32 %s3576_s5, 3 }
 0x4b1   : > { %vm1567_vm13 = vcmp.ne.s32.totalorder %v1467_v30, 0 }
 0x4b2   : > { %v1424_v31 = vpop.f32.mrf.mxu3  ;;  %v1435_v41 = vadd.f32 %v2815_v4, %v1434_v40 }
 0x4b3   : > { %v1568_v31 = vsel %vm1567_vm13, -1e+09, %v3432_v27 }
 0x4b4   : > { %v3872_v44 = vsel %vm1436_vm9, %v2815_v4, %v1435_v41 }
 0x521   : > { %v1430_v45 = vpop.xlane.xlu1 %1429 }
 0x522   : > { %v1438_v46 = vmul.f32 %v3872_v44, %v1430_v45 }
 0x523   : > { %v1442_v47 = vpop.xlane.xlu0 %1441 }
 0x524   : > { %v1444_v48 = vmul.f32 %v1438_v46, %v1438_v46  ;;  %v1443_v49 = vmul.f32 %v1442_v47, %v3872_v44  ;;  %v1446_v59 = vsub.f32 %v1423_v26, %v1438_v46  ;;  %v2585_v26 = vld [vmem:[#allocation17] sm:$0xff] }
 0x525   : > { %1558 = vmatpush.bf16.msrb.mxu2 %v2585_v26 }
 0x526   : > { %v1445_v50 = vsub.f32 %v1443_v49, %v1444_v48 }
 0x528   : > { %v1447_v51 = vadd.f32 1e-05, %v1445_v50  ;;  %2521 = vmatmul.msk.bf16.vlgmr.msrb.gmra.mxu2 %vm998_vm0, %v3868_v36 }
 0x52a   : > { %2816 = vrsqrt.f32 %v1447_v51  ;;  %vm1454_vm11 = vweird.f32 %v1447_v51 }
 0x530   : > { %v2817_v52 = vpop.eup %2816 }
 0x531   : > { %v1449_v53 = vmul.f32 %v2817_v52, %v1447_v51  ;;  %vm1455_vm10 = vweird.f32 %v2817_v52 }
 0x532   : > { %vm1456_vm12 = vmor %vm1454_vm11, %vm1455_vm10 }
 0x533   : > { %v1450_v54 = vmul.f32 %v2817_v52, %v1449_v53 }
 0x535   : > { %v1451_v55 = vmul.f32 0.5, %v1450_v54 }
 0x537   : > { %v1452_v57 = vsub.f32 1.5, %v1451_v55 }
 0x539   : > { %v1453_v58 = vmul.f32 %v2817_v52, %v1452_v57 }
 0x53b   : > { %v1457_v61 = vsel %vm1456_vm12, %v2817_v52, %v1453_v58 }
 0x53c   : > { %v1458_v62 = vmul.f32 %v1457_v61, %v1446_v59 }
 0x53e   : > { %v1462_v0 = vmul.f32 %v2792_v60, %v1458_v62 }
 0x540   : > { %v3876_v1 = vadd.f32 %v2793_v63, %v1462_v0 }
 0x542   : > { %v1468_v2 = vpack.c.bf16 %v3876_v1, %v3876_v1 }
 0x544   : > { %2503 = vmatmul.msk.bf16.vlgmr.msrb.gmra.mxu0 %vm998_vm0, %v1468_v2 }
 0x5ab   : > { %v1560_v45 = vpop.f32.mrf.mxu2 }
 0x5ac   : > { %v1566_v27 = vpack.c.bf16 %v1560_v45, %v1560_v45 }
 0x5ae   : > { %v1617_v49 = vsel %vm1127_vm3, %v1566_v27, 0  ;;  %v1687_v58 = vunpack.c.l.b16 %v1566_v27 }
 0x5af   : > { %1626 = vmatpush.bf16.msra.mxu0 %v1617_v49 }
 0x5b0   : > { %v1688_v59 = vpack.c.b16 %v1687_v58, %v1687_v58 }
 0x5b3   : > { %v1562_v54 = vpop.f32.mrf.mxu2 }
 0x5c1   : > { %v1498_v11 = vpop.f32.mrf.mxu0 }
 0x5c2   : > { %v1502_v12 = vmul.f32 0.35355338, %v1498_v11 }
 0x5c4   : > { %v1564_v13 = vpack.c.bf16 %v1502_v12, %v1502_v12 }
 0x5c6   : > { %v1633_v14 = vunpack.c.l.b16 %v1564_v13  ;;  %2522 = vmatmul.msk.bf16.vlgmr.msrb.gmra.mxu3 %vm1079_vm1, %v1564_v13 }
 0x5c8   : > { %v1634_v15 = vpack.c.b16 %v1633_v14, %v1633_v14 }
 0x5c9   : > { %v1500_v16 = vpop.f32.mrf.mxu0 }
 0x5ca   : > { %1779 = vrot.lane.b32.xlu1 %v1634_v15, %s3431_s20  ;;  %1635 = vrot.lane.b32.xlu2 %v1634_v15, %s3430_s25 }
 0x5d2   : > { %1781 = vrot.lane.b32.xlu2 %v1639_v9, %s3431_s20 }
 0x5da   : > { %1710 = vrot.lane.b32.xlu2 %v1634_v15, %s3429_s23 }
 0x624   : > { %v1636_v22 = vpop.permute.xlu2 %1635 }
 0x625   : > { %2524 = vmatmul.msk.bf16.vlgmr.msra.gmra.mxu1 %vm1079_vm1, %v1636_v22 }
 0x62c   : > { %v1782_v23 = vpop.permute.xlu2 %1781 }
 0x62d   : > { %v1787_v24 = vsel %vm1079_vm1, %v1782_v23, 0 }
 0x62e   : > { %1796 = vmatpush.bf16.xpose.msrb.mxu1 %v1787_v24 }
 0x634   : > { %v1711_v28 = vpop.permute.xlu2 %1710 }
 0x635   : > { %2526 = vmatmul.msk.bf16.vlgmr.msra.gmra.mxu3 %vm1079_vm1, %v1711_v28 }
 0x63c   : > { %v1780_v29 = vpop.permute.xlu1 %1779 }
 0x63d   : > { %2528 = vmatmul.msk.bf16.vlgmr.msrb.gmra.mxu1 %vm1079_vm1, %v1780_v29 }
 0x649   : > { %v1584_v32 = vpop.f32.mrf.mxu3 }
 0x64a   : > { %v1585_v33 = vadd.f32 %v1584_v32, %v1568_v31 }
 0x64c   : > { %v1588_v34 = vsel %vm1079_vm1, %v1585_v33, -inf }
 0x64d   : > { %1589 = vmax.xlane.f32.xlu2 %v1588_v34 }
 0x651   : > { %v1586_v35 = vpop.f32.mrf.mxu3 }
 0x6a2   : > { %v1657_v4 = vpop.f32.mrf.mxu1 }
 0x6a3   : > { %v1658_v37 = vadd.f32 %v1657_v4, %v1568_v31 }
 0x6a5   : > { %v1661_v39 = vsel %vm1079_vm1, %v1658_v37, -inf }
 0x6a6   : > { %1662 = vmax.xlane.f32.xlu0 %v1661_v39 }
 0x6aa   : > { %v1659_v36 = vpop.f32.mrf.mxu1 }
 0x6b8   : > { %v1729_v40 = vpop.f32.mrf.mxu3 }
 0x6b9   : > { %v1730_v41 = vadd.f32 %v1729_v40, %v1568_v31 }
 0x6ba   : > { %v1798_v42 = vpop.f32.mrf.mxu1 }
 0x6bb   : > { %v1733_v43 = vsel %vm1079_vm1, %v1730_v41, -inf  ;;  %v1799_v46 = vadd.f32 %v1798_v42, %v1568_v31 }
 0x6bc   : > { %1734 = vmax.xlane.f32.xlu0 %v1733_v43 }
 0x6bd   : > { %v1802_v53 = vsel %vm1079_vm1, %v1799_v46, -inf }
 0x6c0   : > { %v1731_v47 = vpop.f32.mrf.mxu3  ;;  %v1590_v48 = vpop.xlane.xlu2 %1589 }
 0x6c1   : > { %v1591_v50 = vsub.f32 %v1585_v33, %v1590_v48 }
 0x6c2   : > { %v1800_v51 = vpop.f32.mrf.mxu1 }
 0x6c3   : > { %v1592_v52 = vmul.f32 1.442695, %v1591_v50 }
 0x6c4   : > { %1803 = vmax.xlane.f32.xlu0 %v1802_v53 }
 0x6c5   : > { %2818 = vpow2.f32 %v1592_v52 }
 0x6cb   : > { %v2819_v55 = vpop.eup %2818 }
 0x6cc   : > { %v1594_v57 = vsel %vm1079_vm1, %v2819_v55, 0.0 }
 0x6cd   : > { %1595 = vadd.xlane.f32.xlu0 %v1594_v57 }
 0x6e1   : > { %1689 = vrot.lane.b32.xlu0 %v1688_v59, %s3430_s25 }
 0x719   : > { %v1663_v60 = vpop.xlane.xlu0 %1662 }
 0x71a   : > { %v1664_v61 = vsub.f32 %v1658_v37, %v1663_v60 }
 0x71c   : > { %v1665_v62 = vmul.f32 1.442695, %v1664_v61 }
 0x71e   : > { %2820 = vpow2.f32 %v1665_v62 }
 0x724   : > { %v2821_v63 = vpop.eup %2820 }
 0x725   : > { %v1667_v0 = vsel %vm1079_vm1, %v2821_v63, 0.0 }
 0x726   : > { %1668 = vadd.xlane.f32.xlu1 %v1667_v0 }
 0x72f   : > { %v1735_v2 = vpop.xlane.xlu0 %1734 }
 0x730   : > { %v1736_v3 = vsub.f32 %v1730_v41, %v1735_v2 }
 0x732   : > { %v1737_v6 = vmul.f32 1.442695, %v1736_v3 }
 0x734   : > { %2822 = vpow2.f32 %v1737_v6 }
 0x737   : > { %v1804_v7 = vpop.xlane.xlu0 %1803 }
 0x738   : > { %v1805_v8 = vsub.f32 %v1799_v46, %v1804_v7 }
 0x73a   : > { %v3908_v9 = vpop.eup %2822  ;;  %v1806_v10 = vmul.f32 1.442695, %v1805_v8 }
 0x73b   : > { %v1739_v11 = vsel %vm1079_vm1, %v3908_v9, 0.0 }
 0x73c   : > { %2824 = vpow2.f32 %v1806_v10  ;;  %1740 = vadd.xlane.f32.xlu2 %v1739_v11 }
 0x740   : > { %v1596_v12 = vpop.xlane.xlu0 %1595 }
 0x741   : > { %2826 = vrcp.f32 %v1596_v12  ;;  %v1608_v18 = vand.u32 2147483648, %v1596_v12  ;;  %v1606_v21 = vand.u32 2147483647, %v1596_v12  ;;  %vm1602_vm15 = vweird.f32 %v1596_v12 }
 0x742   : > { %v3912_v13 = vpop.eup %2824 }
 0x743   : > { %v1808_v14 = vsel %vm1079_vm1, %v3912_v13, 0.0  ;;  %v1609_v23 = vor.u32 1.1754944e-38, %v1608_v18  ;;  %vm1607_vm4 = vcmp.eq.f32.partialorder %v1606_v21, 8.507059e+37 }
 0x744   : > { %1809 = vadd.xlane.f32.xlu0 %v1808_v14 }
 0x747   : > { %v2827_v15 = vpop.eup %2826 }
 0x748   : > { %v1598_v16 = vmul.f32 %v2827_v15, %v1596_v12  ;;  %vm1603_vm14 = vweird.f32 %v2827_v15 }
 0x749   : > { %vm1604_vm2 = vmor %vm1602_vm15, %vm1603_vm14 }
 0x74a   : > { %v1599_v17 = vsub.f32 1.0, %v1598_v16 }
 0x74c   : > { %v1600_v19 = vmul.f32 %v2827_v15, %v1599_v17 }
 0x74e   : > { %v1601_v22 = vadd.f32 %v2827_v15, %v1600_v19 }
 0x750   : > { %v1605_v24 = vsel %vm1604_vm2, %v2827_v15, %v1601_v22 }
 0x751   : > { %v1610_v25 = vsel %vm1607_vm4, %v1609_v23, %v1605_v24  ;;  %v2588_v23 = vld [vmem:[#allocation19 + $0x8] sm:$0xff]  ;;  %v2587_v24 = vld [vmem:[#allocation19] sm:$0xff] }
 0x752   : > { %v3916_v26 = vmul.f32 %v2819_v55, %v1610_v25  ;;  %1905 = vmatpush.bf16.msrb.mxu3 %v2588_v23 }
 0x753   : > { %v1690_v28 = vpop.permute.xlu0 %1689 }
 0x754   : > { %1827 = vrot.lane.b32.xlu2 %v1688_v59, %s3431_s20  ;;  %v1612_v29 = vpack.c.bf16 %v3916_v26, %v3916_v26  ;;  %v1695_v30 = vsel %vm1127_vm3, %v1690_v28, 0  ;;  %s4163_s20 = sld [smem:[#allocation58_spill]] }
 0x755   : > { %1704 = vmatpush.bf16.msra.mxu2 %v1695_v30 }
 0x756   : > { %2523 = vmatmul.msk.bf16.vlgmr.msra.gmra.mxu0 %vm1079_vm1, %v1612_v29  ;;  %1906 = vmatpush.bf16.msrb.mxu3 %v2587_v24 }
 0x758   : > { %1758 = vrot.lane.b32.xlu0 %v1688_v59, %s3429_s23  ;;  %s4162_s23 = sld [smem:[#allocation54_spill]] }
 0x75a   : > { %s2100_s24 = scalar_lea.hbm %s4163_s20, %s3986_s9  ;;  %s3278_s11 = scalar_lea.hbm %s4163_s20, 16 }
 0x75b   : > { %s2104_s1 = sshll.u32 %s2100_s24, 4  ;;  %s2105_s1 = int_to_ptr.hbm [resolvable:$true] %s2104_s1 }
 0x799   : > { %v1669_v31 = vpop.xlane.xlu1 %1668 }
 0x79a   : > { %2828 = vrcp.f32 %v1669_v31  ;;  %v1681_v35 = vand.u32 2147483648, %v1669_v31  ;;  %v1679_v37 = vand.u32 2147483647, %v1669_v31  ;;  %vm1675_vm6 = vweird.f32 %v1669_v31 }
 0x79c   : > { %v1682_v36 = vor.u32 1.1754944e-38, %v1681_v35  ;;  %vm1680_vm10 = vcmp.eq.f32.partialorder %v1679_v37, 8.507059e+37 }
 0x7a0   : > { %v2829_v32 = vpop.eup %2828 }
 0x7a1   : > { %v1671_v33 = vmul.f32 %v2829_v32, %v1669_v31  ;;  %vm1676_vm5 = vweird.f32 %v2829_v32 }
 0x7a2   : > { %vm1677_vm9 = vmor %vm1675_vm6, %vm1676_vm5 }
 0x7a3   : > { %v1672_v34 = vsub.f32 1.0, %v1671_v33 }
 0x7a5   : > { %v1673_v4 = vmul.f32 %v2829_v32, %v1672_v34 }
 0x7a7   : > { %v1674_v39 = vadd.f32 %v2829_v32, %v1673_v4 }
 0x7a9   : > { %v1678_v40 = vsel %vm1677_vm9, %v2829_v32, %v1674_v39 }
 0x7aa   : > { %v1683_v41 = vsel %vm1680_vm10, %v1682_v36, %v1678_v40  ;;  %v2589_v40 = vld [vmem:[#allocation23] sm:$0xff]  ;;  %vm2013_vm10 = vcmask 523264  }
 0x7ab   : > { %v3924_v42 = vmul.f32 %v2821_v63, %v1683_v41 }
 0x7ad   : > { %v1685_v43 = vpack.c.bf16 %v3924_v42, %v3924_v42 }
 0x7af   : > { %2525 = vmatmul.msk.bf16.vlgmr.msra.gmra.mxu2 %vm1079_vm1, %v1685_v43  ;;  %v1741_v45 = vpop.xlane.xlu2 %1740 }
 0x7b0   : > { %2830 = vrcp.f32 %v1741_v45  ;;  %v1753_v55 = vand.u32 2147483648, %v1741_v45  ;;  %vm1747_vm12 = vweird.f32 %v1741_v45  ;;  %v1751_v57 = vand.u32 2147483647, %v1741_v45 }
 0x7b2   : > { %v1754_v63 = vor.u32 1.1754944e-38, %v1753_v55  ;;  %vm1752_vm15 = vcmp.eq.f32.partialorder %v1751_v57, 8.507059e+37 }
 0x7b6   : > { %v2831_v27 = vpop.eup %2830 }
 0x7b7   : > { %v1743_v46 = vmul.f32 %v2831_v27, %v1741_v45  ;;  %v1810_v47 = vpop.xlane.xlu0 %1809  ;;  %v1828_v48 = vpop.permute.xlu2 %1827  ;;  %vm1748_vm11 = vweird.f32 %v2831_v27 }
 0x7b8   : > { %2832 = vrcp.f32 %v1810_v47  ;;  %v1833_v50 = vsel %vm1127_vm3, %v1828_v48, 0  ;;  %vm1749_vm13 = vmor %vm1747_vm12, %vm1748_vm11  ;;  %v1822_v59 = vand.u32 2147483648, %v1810_v47  ;;  %v1820_v62 = vand.u32 2147483647, %v1810_v47  ;;  %v2592_v48 = vld [vmem:[%s4162_s23 + $0x8] sm:$0xff] }
 0x7b9   : > { %v1744_v49 = vsub.f32 1.0, %v1743_v46  ;;  %1842 = vmatpush.bf16.msrb.mxu2 %v1833_v50  ;;  %vm1816_vm2 = vweird.f32 %v1810_v47 }
 0x7ba   : > { %v1823_v3 = vor.u32 1.1754944e-38, %v1822_v59  ;;  %vm1821_vm5 = vcmp.eq.f32.partialorder %v1820_v62, 8.507059e+37  ;;  %v2794_v59 = vld [vmem:[#allocation20] ss:$0 sm:$0xff] }
 0x7bb   : > { %v1745_v51 = vmul.f32 %v2831_v27, %v1744_v49 }
 0x7bd   : > { %v1746_v53 = vadd.f32 %v2831_v27, %v1745_v51 }
 0x7be   : > { %v2833_v52 = vpop.eup %2832 }
 0x7bf   : > { %v1812_v54 = vmul.f32 %v2833_v52, %v1810_v47  ;;  %v1750_v60 = vsel %vm1749_vm13, %v2831_v27, %v1746_v53  ;;  %vm1817_vm14 = vweird.f32 %v2833_v52 }
 0x7c0   : > { %v1755_v2 = vsel %vm1752_vm15, %v1754_v63, %v1750_v60  ;;  %vm1818_vm4 = vmor %vm1816_vm2, %vm1817_vm14 }
 0x7c1   : > { %v1813_v58 = vsub.f32 1.0, %v1812_v54  ;;  %v1756_v8 = vmul.f32 %v3908_v9, %v1755_v2  ;;  %v2795_v2 = vld [vmem:[#allocation22] ss:$0 sm:$0xff] }
 0x7c3   : > { %v1814_v61 = vmul.f32 %v2833_v52, %v1813_v58  ;;  %v1757_v15 = vpack.c.bf16 %v1756_v8, %v1756_v8 }
 0x7c5   : > { %v1815_v0 = vadd.f32 %v2833_v52, %v1814_v61 }
 0x7c7   : > { %v1819_v6 = vsel %vm1818_vm4, %v2833_v52, %v1815_v0 }
 0x7c8   : > { %v1824_v7 = vsel %vm1821_vm5, %v1823_v3, %v1819_v6 }
 0x7c9   : > { %v3932_v10 = vmul.f32 %v3912_v13, %v1824_v7 }
 0x7ca   : > { %v1759_v11 = vpop.permute.xlu0 %1758 }
 0x7cb   : > { %v1764_v12 = vsel %vm1127_vm3, %v1759_v11, 0  ;;  %v1826_v14 = vpack.c.bf16 %v3932_v10, %v3932_v10  ;;  %v2591_v11 = vld [vmem:[%s4162_s23] sm:$0xff] }
 0x7cc   : > { %1773 = vmatpush.bf16.msrb.mxu0 %v1764_v12 }
 0x7cd   : > { %2529 = vmatmul.msk.bf16.vlgmr.msrb.gmra.mxu2 %vm1079_vm1, %v1826_v14 }
 0x7cf   : > { %2527 = vmatmul.msk.bf16.vlgmr.msrb.gmra.mxu0 %vm1079_vm1, %v1757_v15 }
 0x7d3   : > { %v1628_v16 = vpop.f32.mrf.mxu0 }
 0x7db   : > { %v1630_v17 = vpop.f32.mrf.mxu0 }
 0x832   : > { %v1706_v18 = vpop.f32.mrf.mxu2 }
 0x833   : > { %1865 = vrot.lane.b32.xlu1 %v1706_v18, %s4117_s0 }
 0x83a   : > { %v1708_v9 = vpop.f32.mrf.mxu2 }
 0x84c   : > { %v1775_v13 = vpop.f32.mrf.mxu0 }
 0x84d   : > { %1869 = vrot.lane.b32.xlu0 %v1775_v13, %s3435_s4 }
 0x850   : > { %v1844_v19 = vpop.f32.mrf.mxu2 }
 0x851   : > { %1873 = vrot.lane.b32.xlu2 %v1844_v19, %s4118_s18 }
 0x854   : > { %v1777_v21 = vpop.f32.mrf.mxu0 }
 0x858   : > { %v1846_v22 = vpop.f32.mrf.mxu2 }
 0x8a5   : > { %v1866_v25 = vpop.permute.xlu1 %1865 }
 0x8a6   : > { %v1876_v28 = vsel %vm1079_vm1, %v1628_v16, %v1866_v25 }
 0x8ab   : > { %v1874_v30 = vpop.permute.xlu2 %1873 }
 0x8bf   : > { %v1870_v29 = vpop.permute.xlu0 %1869 }
 0x8c0   : > { %v1877_v31 = vsel %vm1373_vm7, %v1876_v28, %v1870_v29 }
 0x8c1   : > { %v1878_v32 = vsel %vm1375_vm8, %v1877_v31, %v1874_v30 }
 0x8c2   : > { %v1879_v33 = vpack.c.bf16 %v1878_v32, %v1878_v32 }
 0x8c4   : > { %2538 = vmatmul.msk.bf16.vlgmr.msrb.gmra.mxu3 %vm998_vm0, %v1879_v33 }
 0x947   : > { %v1908_v34 = vpop.f32.mrf.mxu3 }
 0x948   : > { %v1909_v35 = vadd.f32 %v1908_v34, %v3876_v1  ;;  %v2590_v1 = vld [vmem:[#allocation23 + $0x8] sm:$0xff] }
 0x949   : > { %1972 = vmatpush.bf16.msra.mxu0 %v2590_v1 }
 0x94a   : > { %v1914_v4 = vsel %vm998_vm0, %v1909_v35, 0.0  ;;  %v1918_v37 = vmul.f32 %v1909_v35, %v1909_v35 }
 0x94b   : > { %1915 = vadd.xlane.f32.xlu0 %v1914_v4 }
 0x94c   : > { %v1919_v39 = vsel %vm998_vm0, %v1918_v37, 0.0 }
 0x94d   : > { %1920 = vadd.xlane.f32.xlu2 %v1919_v39  ;;  %1973 = vmatpush.bf16.msra.mxu0 %v2589_v40 }
 0x94f   : > { %v1910_v36 = vpop.f32.mrf.mxu3 }
 0x95f   : > { %1365 = vrot.lane.b32.xlu0 %v3848_v5, %s3435_s4 }
 0x965   : > { %1361 = vrot.lane.b32.xlu2 %v3834_v38, %s4117_s0  ;;  %v2594_v38 = vld [vmem:[%s4162_s23 + $0x18] sm:$0xff]  ;;  %s3272_s0 = sshra.s32 %s2105_s1, 4  ;;  %s3273_s0 = int_to_ptr.hbm [resolvable:$true] %s3272_s0 }
 0x966   : > { %2021 = vmatpush.bf16.msra.mxu1 %v2594_v38  ;;  %p3279_p8 = scmp.lt.s32.totalorder %s3273_s0, %s4163_s20 }
 0x967   : > { %1369 = vrot.lane.b32.xlu0 %v3842_v56, %s4118_s18  ;;  %v2593_v56 = vld [vmem:[%s4162_s23 + $0x10] sm:$0xff]  ;;  %s3274_s18 = scalar_lea.hbm %s3273_s0, 8 }
 0x968   : > { %p3275_p1 = scmp.ne.s32.totalorder %s3273_s0, %s3274_s18  ;;  %p3280_p7 = scmp.lt.s32.totalorder %s3278_s11, %s3274_s18 }
 0x96a   : > { %2022 = vmatpush.bf16.msra.mxu1 %v2593_v56  ;;  %p3276_p5 = pnand %p3275_p1, %p3705_p13  ;;  %p3281_p9 = por %p3280_p7, %p3279_p8 }
 0x96c   : > { %p3277_p12 = pneg %p3276_p5 }
 0x96d   : > { %1853 = vrot.lane.b32.xlu2 %v1756_v8, %s3435_s4  ;;  %s2102_s4 = sshll.u32 %s957_s6, 4  ;;  %s2103_s4 = int_to_ptr.vmem [resolvable:$true] %s2102_s4 }
 0x96e   : > { %2023 = vmatpush.bf16.msra.mxu1 %v2592_v48  ;;  %p3282_p10 = pnand %p3281_p9, %p3277_p12 }
 0x972   : > { %2024 = vmatpush.bf16.msra.mxu1 %v2591_v11 }
 0x9be   : > { %v1916_v41 = vpop.xlane.xlu0 %1915 }
 0x9bf   : > { %v1917_v43 = vmul.f32 %v1916_v41, %v3872_v44 }
 0x9c0   : > { %v1921_v45 = vpop.xlane.xlu2 %1920 }
 0x9c1   : > { %v1923_v27 = vmul.f32 %v1917_v43, %v1917_v43  ;;  %v1922_v46 = vmul.f32 %v1921_v45, %v3872_v44  ;;  %v1925_v58 = vsub.f32 %v1909_v35, %v1917_v43 }
 0x9c3   : > { %v1924_v5 = vsub.f32 %v1922_v46, %v1923_v27 }
 0x9c5   : > { %v1926_v47 = vadd.f32 1e-05, %v1924_v5 }
 0x9c7   : > { %2834 = vrsqrt.f32 %v1926_v47  ;;  %vm1933_vm6 = vweird.f32 %v1926_v47 }
 0x9c8   : > { %v1362_v55 = vpop.permute.xlu2 %1361 }
 0x9c9   : > { %v1372_v61 = vsel %vm1079_vm1, %v3823_v20, %v1362_v55 }
 0x9cd   : > { %v2835_v49 = vpop.eup %2834 }
 0x9ce   : > { %v1928_v50 = vmul.f32 %v2835_v49, %v1926_v47  ;;  %vm1934_vm3 = vweird.f32 %v2835_v49 }
 0x9cf   : > { %vm1935_vm9 = vmor %vm1933_vm6, %vm1934_vm3 }
 0x9d0   : > { %v1929_v51 = vmul.f32 %v2835_v49, %v1928_v50 }
 0x9d1   : > { %v1366_v52 = vpop.permute.xlu0 %1365 }
 0x9d2   : > { %v1930_v53 = vmul.f32 0.5, %v1929_v51  ;;  %v1374_v63 = vsel %vm1373_vm7, %v1372_v61, %v1366_v52 }
 0x9d4   : > { %v1931_v54 = vsub.f32 1.5, %v1930_v53 }
 0x9d6   : > { %v1932_v57 = vmul.f32 %v2835_v49, %v1931_v54 }
 0x9d8   : > { %v1936_v60 = vsel %vm1935_vm9, %v2835_v49, %v1932_v57 }
 0x9d9   : > { %v1937_v62 = vmul.f32 %v1936_v60, %v1925_v58  ;;  %v1370_v0 = vpop.permute.xlu0 %1369 }
 0x9da   : > { %v1376_v3 = vsel %vm1375_vm8, %v1374_v63, %v1370_v0 }
 0x9db   : > { %v1941_v6 = vmul.f32 %v2794_v59, %v1937_v62  ;;  %1377 = vst.msk [vmem:[%s957_s6] sm:$0xff] %vm998_vm0, %v1376_v3 }
 0x9dd   : > { %v1945_v7 = vadd.f32 %v2795_v2, %v1941_v6 }
 0x9df   : > { %v1946_v8 = vpack.c.bf16 %v1945_v7, %v1945_v7 }
 0x9e1   : > { %2547 = vmatmul.msk.bf16.vlgmr.msra.gmra.mxu0 %vm998_vm0, %v1946_v8 }
 0xa5e   : > { %v1975_v20 = vpop.f32.mrf.mxu0 }
 0xa5f   : > { %v1979_v12 = vmax.f32 %v1975_v20, 0.0 }
 0xa61   : > { %v1980_v14 = vpack.c.bf16 %v1979_v12, %v1979_v12 }
 0xa63   : > { %2564 = vmatmul.msk.bf16.vlgmr.msra.gmra.mxu1 %vm2013_vm10, %v1980_v14 }
 0xa66   : > { %v1977_v15 = vpop.f32.mrf.mxu0 }
 0xae0   : > { %v2026_v16 = vpop.f32.mrf.mxu1 }
 0xae1   : > { %v3977_v17 = vadd.f32 %v2026_v16, %v1945_v7 }
 0xae3   : > { %v2032_v18 = vsel %vm998_vm0, %v3977_v17, 0.0  ;;  %v2036_v9 = vmul.f32 %v3977_v17, %v3977_v17 }
 0xae4   : > { %2033 = vadd.xlane.f32.xlu1 %v2032_v18 }
 0xae5   : > { %v2037_v13 = vsel %vm998_vm0, %v2036_v9, 0.0 }
 0xae6   : > { %2038 = vadd.xlane.f32.xlu0 %v2037_v13 }
 0xae8   : > { %v2028_v19 = vpop.f32.mrf.mxu1 }
 0xae9   : > { %3285 = shalt.err (!%p3282_p10)
}
 0xaea   : > { %2650 = dma.vmem_to_hbm [thread:$0]  (%p3705_p13), %s2103_s4, 128, %s2105_s1, %s3992_s2   ;;  %v1854_v34 = vpop.permute.xlu2 %1853 }
 0xaeb   : > { %s4164_s6 = smov 24   ;;  %s4165_s7 = smov 8  }
 0xaec   : > { %s4166_s10 = sld [smem:[#allocation59_spill]]  ;;  %s964_s18 = scalar_lea.vmem [#allocation28], %s3741_s19 }
 0xaed   : > { %s4016_s25 = sshll.u32 %s964_s18, 4  ;;  %s4167_s5 = sld [smem:[#allocation55_spill]]  ;;  %s2117_s25 = int_to_ptr.vmem [resolvable:$true] %s4016_s25 }
 0xaee   : > { %s4169_s4 = sld [smem:[#allocation56_spill]]  ;;  %s950_s1 = scalar_lea.vmem [#allocation25], %s3741_s19 }
 0xaf2   : > { %s2114_s0 = scalar_lea.hbm %s4166_s10, %s3986_s9  ;;  %s3306_s12 = scalar_lea.hbm %s4166_s10, 16 }
 0xaf3   : > { %s4018_s24 = sshll.u32 %s2114_s0, 4  ;;  %v2796_v4 = vld [vmem:[%s4167_s5] ss:$0 sm:$0xff]  ;;  %s4038_s5 = sshll.u32 %s950_s1, 4  ;;  %s2119_s24 = int_to_ptr.hbm [resolvable:$true] %s4018_s24  ;;  %s2089_s5 = int_to_ptr.vmem [resolvable:$true] %s4038_s5 }
 0xaf4   : > { %v2797_v43 = vld [vmem:[%s4169_s4] ss:$0 sm:$0xff] }
 0xafa   : > { %1857 = vrot.lane.b32.xlu0 %v3932_v10, %s4164_s6 }
 0xafd   : > { %1849 = vrot.lane.b32.xlu1 %v3924_v42, %s4165_s7  ;;  %s4168_s7 = sld [smem:[#allocation57_spill]] }
 0xb03   : > { %s2086_s11 = scalar_lea.hbm %s4168_s7, %s3986_s9  ;;  %s3300_s9 = sshra.s32 %s2119_s24, 4  ;;  %s3301_s9 = int_to_ptr.hbm [resolvable:$true] %s3300_s9 }
 0xb04   : > { %s4040_s13 = sshll.u32 %s2086_s11, 4  ;;  %s3302_s17 = scalar_lea.hbm %s3301_s9, 8  ;;  %s2091_s13 = int_to_ptr.hbm [resolvable:$true] %s4040_s13 }
 0xb05   : > { %p3303_p11 = scmp.ne.s32.totalorder %s3301_s9, %s3302_s17  ;;  %p3307_p6 = scmp.lt.s32.totalorder %s3301_s9, %s4166_s10 }
 0xb06   : > { %p3308_p3 = scmp.lt.s32.totalorder %s3306_s12, %s3302_s17 }
 0xb07   : > { %p3304_p0 = pnand %p3303_p11, %p3705_p13 }
 0xb08   : > { %p3309_p1 = por %p3308_p3, %p3307_p6 }
 0xb09   : > { %p3305_p2 = pneg %p3304_p0 }
 0xb0b   : > { %p3310_p5 = pnand %p3309_p1, %p3305_p2 }
 0xb57   : > { %v2034_v21 = vpop.xlane.xlu1 %2033 }
 0xb58   : > { %v2035_v22 = vmul.f32 %v2034_v21, %v3872_v44 }
 0xb59   : > { %v2039_v23 = vpop.xlane.xlu0 %2038 }
 0xb5a   : > { %v2041_v24 = vmul.f32 %v2035_v22, %v2035_v22  ;;  %v2040_v25 = vmul.f32 %v2039_v23, %v3872_v44  ;;  %v2043_v35 = vsub.f32 %v3977_v17, %v2035_v22 }
 0xb5c   : > { %v2042_v28 = vsub.f32 %v2040_v25, %v2041_v24 }
 0xb5e   : > { %v2044_v29 = vadd.f32 1e-05, %v2042_v28 }
 0xb60   : > { %2836 = vrsqrt.f32 %v2044_v29  ;;  %vm2051_vm12 = vweird.f32 %v2044_v29 }
 0xb66   : > { %v2837_v30 = vpop.eup %2836 }
 0xb67   : > { %v2046_v31 = vmul.f32 %v2837_v30, %v2044_v29  ;;  %vm2052_vm11 = vweird.f32 %v2837_v30 }
 0xb68   : > { %vm2053_vm13 = vmor %vm2051_vm12, %vm2052_vm11 }
 0xb69   : > { %v2047_v32 = vmul.f32 %v2837_v30, %v2046_v31 }
 0xb6b   : > { %v2048_v33 = vmul.f32 0.5, %v2047_v32 }
 0xb6c   : > { %v1858_v36 = vpop.permute.xlu0 %1857 }
 0xb6d   : > { %v2049_v42 = vsub.f32 1.5, %v2048_v33 }
 0xb6f   : > { %v2050_v44 = vmul.f32 %v2837_v30, %v2049_v42  ;;  %v1850_v10 = vpop.permute.xlu1 %1849 }
 0xb70   : > { %v1860_v37 = vsel %vm1079_vm1, %v3916_v26, %v1850_v10 }
 0xb71   : > { %v2054_v39 = vsel %vm2053_vm13, %v2837_v30, %v2050_v44  ;;  %v1861_v1 = vsel %vm1373_vm7, %v1860_v37, %v1854_v34 }
 0xb72   : > { %v2055_v40 = vmul.f32 %v2054_v39, %v2043_v35  ;;  %v1862_v41 = vsel %vm1375_vm8, %v1861_v1, %v1858_v36 }
 0xb73   : > { %1863 = vst.msk [vmem:[%s964_s18] sm:$0xff] %vm998_vm0, %v1862_v41 }
 0xb74   : > { %v2059_v26 = vmul.f32 %v2796_v4, %v2055_v40 }
 0xb75   : > { %3313 = shalt.err (!%p3310_p5)
}
 0xb76   : > { %2651 = dma.vmem_to_hbm [thread:$0]  (%p3705_p13), %s2117_s25, 128, %s2119_s24, %s3992_s2   ;;  %v2063_v45 = vadd.f32 %v2797_v43, %v2059_v26 }
 0xb77   : > { %s2066_s14 = scalar_lea.sflag [#allocation4], %s3738_s22  ;;  %s3328_s18 = sshra.s32 %s2091_s13, 4  ;;  %s3329_s18 = int_to_ptr.hbm [resolvable:$true] %s3328_s18 }
 0xb78   : > { %2064 = vst.msk [vmem:[%s950_s1] sm:$0xff] %vm998_vm0, %v2063_v45  ;;  %s3330_s11 = scalar_lea.hbm %s3329_s18, 8  ;;  %s3334_s17 = scalar_lea.hbm %s4168_s7, 16 }
 0xb79   : > { %p3331_p12 = scmp.ne.s32.totalorder %s3329_s18, %s3330_s11  ;;  %p3335_p9 = scmp.lt.s32.totalorder %s3329_s18, %s4168_s7 }
 0xb7a   : > { %p3336_p10 = scmp.lt.s32.totalorder %s3334_s17, %s3330_s11 }
 0xb7b   : > { %p3332_p8 = pnand %p3331_p12, %p3705_p13 }
 0xb7c   : > { %p3337_p11 = por %p3336_p10, %p3335_p9 }
 0xb7d   : > { %p3333_p7 = pneg %p3332_p8 }
 0xb7f   : > { %p3338_p0 = pnand %p3337_p11, %p3333_p7 }
 0xb81   : > { %3341 = shalt.err (!%p3338_p0)
}
 0xb82   : > { %2649 = dma.vmem_to_hbm [thread:$0]  (%p3705_p13), %s2089_s5, 128, %s2091_s13, %s2066_s14  }
 0xb83 PF: > { %s2130_s22 = sand.u32 1, %s3400_s3   ;;  %p4170_p2 = scmp.ge.s32.totalorder %s3412_s30, 2 }
 0xb84   : > { %s2131_s2 = scalar_lea.sflag [#allocation4], %s2130_s22 }
 0xb85   : > { %p2700_p6 = pnand %p4170_p2, %p3712_p4 }
 0xb87   : > { %p2701_p3 = pneg %p2700_p6 }
 0xb89   : > { %3391 = dma.done.wait (%p2701_p3), %s2131_s2, 128  }
 0xb8a   : > { %3393 = vsyncadd (%p2701_p3), %s2131_s2, 4294967168  ;;  %s4171_s25 = sadd.s32 4294967294, %s3412_s30  }
 0xb8b   : > { %s2140_s24 = sand.u32 1, %s4171_s25  }
 0xb8c   : > { %s2141_s1 = scalar_lea.sflag [#allocation27], %s2140_s24 }
 0xb8d   : > { %3395 = dma.done.wait (%p2701_p3), %s2141_s1, 256  }
 0xb8e   : > { %3397 = vsyncadd (%p2701_p3), %s2141_s1, 4294967040  ;;  %p46_p13 = scmp.ge.s32.totalorder %s3685_s8, 4   ;;  %s4172_s3 = smov %s3404_s28 }
 0xb8f   : > { %s4173_s28 = smov %s3408_s29  ;;  %s4174_s29 = smov %s3697_s27 }
 0xb90   : > { %s4175_s30 = smov %s3685_s8  ;;  %48 = sbr.rel (!%p46_p13) target bundleno = 36 (0x24), region = 238 }
 0xb95   :  { %2157 = vsyncpa [#allocation3], 1 }
 0xb96   :  { %2159 = vsyncpa [#allocation3 + $0x1], 1 }
 0xb97   :  { %2160 = vsyncpa [#allocation6], 1 }
 0xb98   :  { %2161 = vsyncpa [#allocation9], 1 }
 0xb99   :  { %2162 = vsyncpa [#allocation12], 1 }
 0xb9a   :  { %2163 = vsyncpa [#allocation15], 1 }
 0xb9b   :  { %2164 = vsyncpa [#allocation18], 1 }
 0xb9c   :  { %2165 = vsyncpa [#allocation21], 1 }
 0xb9d   :  { %2166 = vsyncpa [#allocation24], 1 }
 0xb9e   :  { %2167 = vsyncpa [#allocation4], 1 }
 0xb9f   :  { %2169 = vsyncpa [#allocation4 + $0x1], 1 }
 0xba0   :  { %2170 = vsyncpa [#allocation27], 1 }
 0xba1   :  { %2172 = vsyncpa [#allocation27 + $0x1], 1 }

</bundles_post_ra>
